<compile_context>
chip_gen: v7x
topology: tpu7x:2x2x1
jax: 0.10.0
libtpu: 0.0.40
codegen_flags: <defaults>
</compile_context>

<pallas_src>
import jax
import jax.numpy as jnp
from jax.experimental import pallas as pl
from jax.experimental.pallas import tpu as pltpu

LN_EPS = 1e-5    # nn.LayerNorm default eps
L2_EPS = 1e-12   # F.normalize default eps


def _layernorm(a, g, b):
    mu = jnp.mean(a, axis=-1, keepdims=True)
    xc = a - mu
    var = jnp.mean(xc * xc, axis=-1, keepdims=True)
    return xc * jax.lax.rsqrt(var + LN_EPS) * g + b


def _l2norm(a):
    nrm = jnp.sqrt(jnp.sum(a * a, axis=-1, keepdims=True))
    return a / jnp.maximum(nrm, L2_EPS)


def make_perceiver_attention_call(B, N, M, DIM, HEADS, DHEAD, SCALE):
    """Fused PerceiverAttention forward. One grid step per batch element."""
    NM = N + M

    def kernel(x_ref, lat_ref,
               gx_ref, bx_ref, gl_ref, bl_ref,
               wq_ref, wk_ref, wv_ref, wo_ref,
               qs_ref, ks_ref, go_ref, bo_ref,
               o_ref, kvin_ref):
        # ---- LayerNorm(x), LayerNorm(latents) ----
        xn = _layernorm(x_ref[0], gx_ref[...], bx_ref[...])        # (N, DIM)
        ln = _layernorm(lat_ref[0], gl_ref[...], bl_ref[...])      # (M, DIM)

        # ---- kv_input = concat(x, latents) along sequence (VMEM scratch,
        #      both stores sublane-aligned) ----
        kvin_ref[0:N, :] = xn
        kvin_ref[N:NM, :] = ln
        kvin = kvin_ref[...]                                       # (NM, DIM)

        qs = qs_ref[...]                                           # (1, DHEAD)
        ks = ks_ref[...]                                           # (1, DHEAD)

        # ---- per-head attention, unrolled; output projection accumulated ----
        acc = jnp.zeros((M, DIM), jnp.float32)
        for h in range(HEADS):
            qh = jnp.dot(ln, wq_ref[h], preferred_element_type=jnp.float32)    # (M, DHEAD)
            kh = jnp.dot(kvin, wk_ref[h], preferred_element_type=jnp.float32)  # (NM, DHEAD)
            vh = jnp.dot(kvin, wv_ref[h], preferred_element_type=jnp.float32)  # (NM, DHEAD)

            qh = _l2norm(qh) * qs
            kh = _l2norm(kh) * ks

            # sim = q @ k^T * scale  (contract last dims, no explicit transpose)
            sim = jax.lax.dot_general(
                qh, kh, (((1,), (1,)), ((), ())),
                preferred_element_type=jnp.float32) * SCALE        # (M, NM)

            # TODO(synk): optional boolean key mask (masked_fill) path is not
            # instantiated here (module default mask=None).

            # f32 softmax over keys
            sim = sim - jnp.max(sim, axis=-1, keepdims=True)
            p = jnp.exp(sim)
            attn = p / jnp.sum(p, axis=-1, keepdims=True)

            oh = jnp.dot(attn, vh, preferred_element_type=jnp.float32)          # (M, DHEAD)
            acc = acc + jnp.dot(oh, wo_ref[h], preferred_element_type=jnp.float32)

        # ---- to_out: final LayerNorm (Linear already folded into acc) ----
        o_ref[0] = _layernorm(acc, go_ref[...], bo_ref[...])

    return pl.pallas_call(
        kernel,
        out_shape=jax.ShapeDtypeStruct((B, M, DIM), jnp.float32),
        grid=(B,),
        in_specs=[
            pl.BlockSpec((1, N, DIM), lambda b: (b, 0, 0)),          # x
            pl.BlockSpec((1, M, DIM), lambda b: (b, 0, 0)),          # latents
            pl.BlockSpec((1, DIM), lambda b: (0, 0)),                # norm(x) gamma
            pl.BlockSpec((1, DIM), lambda b: (0, 0)),                # norm(x) beta
            pl.BlockSpec((1, DIM), lambda b: (0, 0)),                # norm(latents) gamma
            pl.BlockSpec((1, DIM), lambda b: (0, 0)),                # norm(latents) beta
            pl.BlockSpec((HEADS, DIM, DHEAD), lambda b: (0, 0, 0)),  # Wq per head
            pl.BlockSpec((HEADS, DIM, DHEAD), lambda b: (0, 0, 0)),  # Wk per head
            pl.BlockSpec((HEADS, DIM, DHEAD), lambda b: (0, 0, 0)),  # Wv per head
            pl.BlockSpec((HEADS, DHEAD, DIM), lambda b: (0, 0, 0)),  # Wout per head
            pl.BlockSpec((1, DHEAD), lambda b: (0, 0)),              # q_scale
            pl.BlockSpec((1, DHEAD), lambda b: (0, 0)),              # k_scale
            pl.BlockSpec((1, DIM), lambda b: (0, 0)),                # out LN gamma
            pl.BlockSpec((1, DIM), lambda b: (0, 0)),                # out LN beta
        ],
        out_specs=pl.BlockSpec((1, M, DIM), lambda b: (b, 0, 0)),
        scratch_shapes=[pltpu.VMEM((NM, DIM), jnp.float32)],
        compiler_params=pltpu.CompilerParams(
            dimension_semantics=("parallel",)),
    )


# ---------------------------------------------------------------------------
# Public wrapper: takes PyTorch-style parameters, pre-splits weights per head.
# ---------------------------------------------------------------------------
def perceiver_attention_forward(params, x, latents, *, heads, dim_head, scale=8.0):
    B, N, DIM = x.shape
    _, M, _ = latents.shape

    # rearrange 'b n (h d)' => per-head weight slabs (zero-cost host reshape)
    wq = params["wq"].reshape(DIM, heads, dim_head).transpose(1, 0, 2)   # (H, DIM, D)
    wk = params["wk"].reshape(DIM, heads, dim_head).transpose(1, 0, 2)   # (H, DIM, D)
    wv = params["wv"].reshape(DIM, heads, dim_head).transpose(1, 0, 2)   # (H, DIM, D)
    wo = params["wo"].reshape(heads, dim_head, DIM)                      # (H, D, DIM)

    call = make_perceiver_attention_call(B, N, M, DIM, heads, dim_head, float(scale))
    return call(
        x.astype(jnp.float32), latents.astype(jnp.float32),
        params["ln_x_g"].reshape(1, DIM), params["ln_x_b"].reshape(1, DIM),
        params["ln_l_g"].reshape(1, DIM), params["ln_l_b"].reshape(1, DIM),
        wq, wk, wv, wo,
        params["q_scale"].reshape(1, dim_head), params["k_scale"].reshape(1, dim_head),
        params["ln_o_g"].reshape(1, DIM), params["ln_o_b"].reshape(1, DIM),
    )


# ---------------------------------------------------------------------------
# Pure-JAX reference for validation (mirrors the PyTorch module exactly).
# ---------------------------------------------------------------------------
def reference_forward(params, x, latents, *, heads, dim_head, scale=8.0):
    def ln(a, g, b):
        mu = a.mean(-1, keepdims=True)
        v = ((a - mu) ** 2).mean(-1, keepdims=True)
        return (a - mu) / jnp.sqrt(v + LN_EPS) * g + b

    def l2n(t):
        n = jnp.sqrt(jnp.sum(t * t, -1, keepdims=True))
        return t / jnp.maximum(n, L2_EPS)

    B, N, D = x.shape
    M = latents.shape[1]
    xn = ln(x, params["ln_x_g"], params["ln_x_b"])
    la = ln(latents, params["ln_l_g"], params["ln_l_b"])

    q = la @ params["wq"]                              # (B, M, inner)
    kvin = jnp.concatenate([xn, la], axis=1)           # (B, N+M, D)
    k = kvin @ params["wk"]
    v = kvin @ params["wv"]

    def split(t):
        b, n, _ = t.shape
        return t.reshape(b, n, heads, dim_head).transpose(0, 2, 1, 3)

    q, k, v = map(split, (q, k, v))                    # (B, H, *, D)
    q = l2n(q) * params["q_scale"]
    k = l2n(k) * params["k_scale"]

    sim = jnp.einsum("bhid,bhjd->bhij", q, k) * scale
    attn = jax.nn.softmax(sim.astype(jnp.float32), axis=-1)
    out = jnp.einsum("bhij,bhjd->bhid", attn, v)
    out = out.transpose(0, 2, 1, 3).reshape(B, M, heads * dim_head)
    out = out @ params["wo"]
    return ln(out, params["ln_o_g"], params["ln_o_b"])


if __name__ == "__main__":
    # Small config consistent with the module (default dim_head=64).
    B, N, M = 2, 16, 8            # batch, x sequence, latents
    DIM, HEADS, DHEAD = 128, 2, 64
    INNER = HEADS * DHEAD         # 128 -> lane-dense everywhere
    SCALE = 8.0

    key = jax.random.PRNGKey(0)
    ks = jax.random.split(key, 14)
    f32 = jnp.float32
    params = {
        # LayerNorm affine params
        "ln_x_g": 1.0 + 0.1 * jax.random.normal(ks[0], (DIM,), f32),
        "ln_x_b": 0.1 * jax.random.normal(ks[1], (DIM,), f32),
        "ln_l_g": 1.0 + 0.1 * jax.random.normal(ks[2], (DIM,), f32),
        "ln_l_b": 0.1 * jax.random.normal(ks[3], (DIM,), f32),
        "ln_o_g": 1.0 + 0.1 * jax.random.normal(ks[4], (DIM,), f32),
        "ln_o_b": 0.1 * jax.random.normal(ks[5], (DIM,), f32),
        # to_q / to_kv (kv split into k, v column halves) / to_out linear, all bias-free
        "wq": jax.random.normal(ks[6], (DIM, INNER), f32) * 0.05,
        "wk": jax.random.normal(ks[7], (DIM, INNER), f32) * 0.05,
        "wv": jax.random.normal(ks[8], (DIM, INNER), f32) * 0.05,
        "wo": jax.random.normal(ks[9], (INNER, DIM), f32) * 0.05,
        # learned per-dim_head scales
        "q_scale": 1.0 + 0.1 * jax.random.normal(ks[10], (DHEAD,), f32),
        "k_scale": 1.0 + 0.1 * jax.random.normal(ks[11], (DHEAD,), f32),
    }

    x = jax.random.normal(ks[12], (B, N, DIM), f32)
    latents = jax.random.normal(ks[13], (B, M, DIM), f32)

    out = perceiver_attention_forward(params, x, latents,
                                      heads=HEADS, dim_head=DHEAD, scale=SCALE)
    out = jax.block_until_ready(out)

    ref = reference_forward(params, x, latents,
                            heads=HEADS, dim_head=DHEAD, scale=SCALE)
    assert out.shape == (B, M, DIM), out.shape
    max_err = float(jnp.max(jnp.abs(out - ref)))
    assert max_err < 1e-3, f"mismatch vs reference, max abs err = {max_err}"
    print("KERNEL_OK")
</pallas_src>

<mosaic_0001>
module attributes {stable_mosaic.version = 11 : i64} {
  func.func @kernel(%arg0: i32, %arg1: memref<1x16x128xf32, #tpu.memory_space<vmem>>, %arg2: memref<1x8x128xf32, #tpu.memory_space<vmem>>, %arg3: memref<1x128xf32, #tpu.memory_space<vmem>>, %arg4: memref<1x128xf32, #tpu.memory_space<vmem>>, %arg5: memref<1x128xf32, #tpu.memory_space<vmem>>, %arg6: memref<1x128xf32, #tpu.memory_space<vmem>>, %arg7: memref<2x128x64xf32, #tpu.memory_space<vmem>>, %arg8: memref<2x128x64xf32, #tpu.memory_space<vmem>>, %arg9: memref<2x128x64xf32, #tpu.memory_space<vmem>>, %arg10: memref<2x64x128xf32, #tpu.memory_space<vmem>>, %arg11: memref<1x64xf32, #tpu.memory_space<vmem>>, %arg12: memref<1x64xf32, #tpu.memory_space<vmem>>, %arg13: memref<1x128xf32, #tpu.memory_space<vmem>>, %arg14: memref<1x128xf32, #tpu.memory_space<vmem>>, %arg15: memref<1x8x128xf32, #tpu.memory_space<vmem>>, %arg16: memref<24x128xf32, #tpu.memory_space<vmem>>) attributes {dimension_semantics = [#tpu.dimension_semantics<parallel>], iteration_bounds = array<i64: 2>, scalar_prefetch = 0 : i64, scratch_operands = 1 : i64, tpu.core_type = #tpu.core_type<tc>, window_params = [{transform_indices = @transform_0, window_bounds = array<i64: 1, 16, 128>}, {transform_indices = @transform_1, window_bounds = array<i64: 1, 8, 128>}, {pipeline_mode = #tpu.pipeline_mode<synchronous>, transform_indices = @transform_2, window_bounds = array<i64: 1, 128>}, {pipeline_mode = #tpu.pipeline_mode<synchronous>, transform_indices = @transform_3, window_bounds = array<i64: 1, 128>}, {pipeline_mode = #tpu.pipeline_mode<synchronous>, transform_indices = @transform_4, window_bounds = array<i64: 1, 128>}, {pipeline_mode = #tpu.pipeline_mode<synchronous>, transform_indices = @transform_5, window_bounds = array<i64: 1, 128>}, {pipeline_mode = #tpu.pipeline_mode<synchronous>, transform_indices = @transform_6, window_bounds = array<i64: 2, 128, 64>}, {pipeline_mode = #tpu.pipeline_mode<synchronous>, transform_indices = @transform_7, window_bounds = array<i64: 2, 128, 64>}, {pipeline_mode = #tpu.pipeline_mode<synchronous>, transform_indices = @transform_8, window_bounds = array<i64: 2, 128, 64>}, {pipeline_mode = #tpu.pipeline_mode<synchronous>, transform_indices = @transform_9, window_bounds = array<i64: 2, 64, 128>}, {pipeline_mode = #tpu.pipeline_mode<synchronous>, transform_indices = @transform_10, window_bounds = array<i64: 1, 64>}, {pipeline_mode = #tpu.pipeline_mode<synchronous>, transform_indices = @transform_11, window_bounds = array<i64: 1, 64>}, {pipeline_mode = #tpu.pipeline_mode<synchronous>, transform_indices = @transform_12, window_bounds = array<i64: 1, 128>}, {pipeline_mode = #tpu.pipeline_mode<synchronous>, transform_indices = @transform_13, window_bounds = array<i64: 1, 128>}, {transform_indices = @transform_14, window_bounds = array<i64: 1, 8, 128>}]} {
    %c0 = arith.constant 0 : index
    %c0_0 = arith.constant 0 : index
    %c0_1 = arith.constant 0 : index
    %0 = vector.load %arg1[%c0, %c0_0, %c0_1] : memref<1x16x128xf32, #tpu.memory_space<vmem>>, vector<1x16x128xf32>
    %1 = vector.shape_cast %0 : vector<1x16x128xf32> to vector<16x128xf32>
    %c0_2 = arith.constant 0 : index
    %c0_3 = arith.constant 0 : index
    %2 = vector.load %arg3[%c0_2, %c0_3] : memref<1x128xf32, #tpu.memory_space<vmem>>, vector<1x128xf32>
    %c0_4 = arith.constant 0 : index
    %c0_5 = arith.constant 0 : index
    %3 = vector.load %arg4[%c0_4, %c0_5] : memref<1x128xf32, #tpu.memory_space<vmem>>, vector<1x128xf32>
    %cst = arith.constant dense<0.000000e+00> : vector<16xf32>
    %4 = vector.multi_reduction <add>, %1, %cst [1] : vector<16x128xf32> to vector<16xf32>
    %5 = vector.shape_cast %4 : vector<16xf32> to vector<16x1xf32>
    %cst_6 = arith.constant 1.280000e+02 : f32
    %6 = vector.broadcast %cst_6 : f32 to vector<16x1xf32>
    %7 = arith.divf %5, %6 : vector<16x1xf32>
    %8 = vector.broadcast %7 : vector<16x1xf32> to vector<16x128xf32>
    %9 = arith.subf %1, %8 : vector<16x128xf32>
    %10 = arith.mulf %9, %9 : vector<16x128xf32>
    %cst_7 = arith.constant dense<0.000000e+00> : vector<16xf32>
    %11 = vector.multi_reduction <add>, %10, %cst_7 [1] : vector<16x128xf32> to vector<16xf32>
    %12 = vector.shape_cast %11 : vector<16xf32> to vector<16x1xf32>
    %cst_8 = arith.constant 1.280000e+02 : f32
    %13 = vector.broadcast %cst_8 : f32 to vector<16x1xf32>
    %14 = arith.divf %12, %13 : vector<16x1xf32>
    %cst_9 = arith.constant 9.99999974E-6 : f32
    %15 = vector.broadcast %cst_9 : f32 to vector<16x1xf32>
    %16 = arith.addf %14, %15 : vector<16x1xf32>
    %17 = math.rsqrt %16 : vector<16x1xf32>
    %18 = vector.broadcast %17 : vector<16x1xf32> to vector<16x128xf32>
    %19 = arith.mulf %9, %18 : vector<16x128xf32>
    %20 = vector.broadcast %2 : vector<1x128xf32> to vector<16x128xf32>
    %21 = arith.mulf %19, %20 : vector<16x128xf32>
    %22 = vector.broadcast %3 : vector<1x128xf32> to vector<16x128xf32>
    %23 = arith.addf %21, %22 : vector<16x128xf32>
    %c0_10 = arith.constant 0 : index
    %c0_11 = arith.constant 0 : index
    %c0_12 = arith.constant 0 : index
    %24 = vector.load %arg2[%c0_10, %c0_11, %c0_12] : memref<1x8x128xf32, #tpu.memory_space<vmem>>, vector<1x8x128xf32>
    %25 = vector.shape_cast %24 : vector<1x8x128xf32> to vector<8x128xf32>
    %c0_13 = arith.constant 0 : index
    %c0_14 = arith.constant 0 : index
    %26 = vector.load %arg5[%c0_13, %c0_14] : memref<1x128xf32, #tpu.memory_space<vmem>>, vector<1x128xf32>
    %c0_15 = arith.constant 0 : index
    %c0_16 = arith.constant 0 : index
    %27 = vector.load %arg6[%c0_15, %c0_16] : memref<1x128xf32, #tpu.memory_space<vmem>>, vector<1x128xf32>
    %cst_17 = arith.constant dense<0.000000e+00> : vector<8xf32>
    %28 = vector.multi_reduction <add>, %25, %cst_17 [1] : vector<8x128xf32> to vector<8xf32>
    %29 = vector.shape_cast %28 : vector<8xf32> to vector<8x1xf32>
    %cst_18 = arith.constant 1.280000e+02 : f32
    %30 = vector.broadcast %cst_18 : f32 to vector<8x1xf32>
    %31 = arith.divf %29, %30 : vector<8x1xf32>
    %32 = vector.broadcast %31 : vector<8x1xf32> to vector<8x128xf32>
    %33 = arith.subf %25, %32 : vector<8x128xf32>
    %34 = arith.mulf %33, %33 : vector<8x128xf32>
    %cst_19 = arith.constant dense<0.000000e+00> : vector<8xf32>
    %35 = vector.multi_reduction <add>, %34, %cst_19 [1] : vector<8x128xf32> to vector<8xf32>
    %36 = vector.shape_cast %35 : vector<8xf32> to vector<8x1xf32>
    %cst_20 = arith.constant 1.280000e+02 : f32
    %37 = vector.broadcast %cst_20 : f32 to vector<8x1xf32>
    %38 = arith.divf %36, %37 : vector<8x1xf32>
    %cst_21 = arith.constant 9.99999974E-6 : f32
    %39 = vector.broadcast %cst_21 : f32 to vector<8x1xf32>
    %40 = arith.addf %38, %39 : vector<8x1xf32>
    %41 = math.rsqrt %40 : vector<8x1xf32>
    %42 = vector.broadcast %41 : vector<8x1xf32> to vector<8x128xf32>
    %43 = arith.mulf %33, %42 : vector<8x128xf32>
    %44 = vector.broadcast %26 : vector<1x128xf32> to vector<8x128xf32>
    %45 = arith.mulf %43, %44 : vector<8x128xf32>
    %46 = vector.broadcast %27 : vector<1x128xf32> to vector<8x128xf32>
    %47 = arith.addf %45, %46 : vector<8x128xf32>
    %c0_22 = arith.constant 0 : index
    %c0_23 = arith.constant 0 : index
    %48 = vector.load %arg16[%c0_22, %c0_23] : memref<24x128xf32, #tpu.memory_space<vmem>>, vector<16x128xf32>
    tpu.vector_store %arg16[%c0_22, %c0_23], %23 {strides = array<i32>} : memref<24x128xf32, #tpu.memory_space<vmem>>, vector<16x128xf32>,
    %c16 = arith.constant 16 : index
    %c0_24 = arith.constant 0 : index
    %49 = vector.load %arg16[%c16, %c0_24] : memref<24x128xf32, #tpu.memory_space<vmem>>, vector<8x128xf32>
    tpu.vector_store %arg16[%c16, %c0_24], %47 {strides = array<i32>} : memref<24x128xf32, #tpu.memory_space<vmem>>, vector<8x128xf32>,
    %c0_25 = arith.constant 0 : index
    %c0_26 = arith.constant 0 : index
    %50 = vector.load %arg16[%c0_25, %c0_26] : memref<24x128xf32, #tpu.memory_space<vmem>>, vector<24x128xf32>
    %c0_27 = arith.constant 0 : index
    %c0_28 = arith.constant 0 : index
    %51 = vector.load %arg11[%c0_27, %c0_28] : memref<1x64xf32, #tpu.memory_space<vmem>>, vector<1x64xf32>
    %c0_29 = arith.constant 0 : index
    %c0_30 = arith.constant 0 : index
    %52 = vector.load %arg12[%c0_29, %c0_30] : memref<1x64xf32, #tpu.memory_space<vmem>>, vector<1x64xf32>
    %cst_31 = arith.constant 0.000000e+00 : f32
    %53 = vector.broadcast %cst_31 : f32 to vector<8x128xf32>
    %c0_32 = arith.constant 0 : index
    %c0_33 = arith.constant 0 : index
    %c0_34 = arith.constant 0 : index
    %54 = vector.load %arg7[%c0_32, %c0_33, %c0_34] : memref<2x128x64xf32, #tpu.memory_space<vmem>>, vector<1x128x64xf32>
    %55 = vector.shape_cast %54 : vector<1x128x64xf32> to vector<128x64xf32>
    %cst_35 = arith.constant dense<0.000000e+00> : vector<8x64xf32>
    %56 = tpu.matmul %47, %55, %cst_35 {dimension_numbers = #tpu.dot_dimension_numbers<[1], [0], [0], [1], [0, 0, 1, 1], [], []>} : vector<8x128xf32>, vector<128x64xf32>, vector<8x64xf32> -> vector<8x64xf32>
    %c0_36 = arith.constant 0 : index
    %c0_37 = arith.constant 0 : index
    %c0_38 = arith.constant 0 : index
    %57 = vector.load %arg8[%c0_36, %c0_37, %c0_38] : memref<2x128x64xf32, #tpu.memory_space<vmem>>, vector<1x128x64xf32>
    %58 = vector.shape_cast %57 : vector<1x128x64xf32> to vector<128x64xf32>
    %cst_39 = arith.constant dense<0.000000e+00> : vector<24x64xf32>
    %59 = tpu.matmul %50, %58, %cst_39 {dimension_numbers = #tpu.dot_dimension_numbers<[1], [0], [0], [1], [0, 0, 1, 1], [], []>} : vector<24x128xf32>, vector<128x64xf32>, vector<24x64xf32> -> vector<24x64xf32>
    %c0_40 = arith.constant 0 : index
    %c0_41 = arith.constant 0 : index
    %c0_42 = arith.constant 0 : index
    %60 = vector.load %arg9[%c0_40, %c0_41, %c0_42] : memref<2x128x64xf32, #tpu.memory_space<vmem>>, vector<1x128x64xf32>
    %61 = vector.shape_cast %60 : vector<1x128x64xf32> to vector<128x64xf32>
    %cst_43 = arith.constant dense<0.000000e+00> : vector<24x64xf32>
    %62 = tpu.matmul %50, %61, %cst_43 {dimension_numbers = #tpu.dot_dimension_numbers<[1], [0], [0], [1], [0, 0, 1, 1], [], []>} : vector<24x128xf32>, vector<128x64xf32>, vector<24x64xf32> -> vector<24x64xf32>
    %63 = arith.mulf %56, %56 : vector<8x64xf32>
    %cst_44 = arith.constant dense<0.000000e+00> : vector<8xf32>
    %64 = vector.multi_reduction <add>, %63, %cst_44 [1] : vector<8x64xf32> to vector<8xf32>
    %65 = vector.shape_cast %64 : vector<8xf32> to vector<8x1xf32>
    %66 = math.sqrt %65 : vector<8x1xf32>
    %cst_45 = arith.constant 9.99999996E-13 : f32
    %67 = vector.broadcast %cst_45 : f32 to vector<8x1xf32>
    %68 = arith.maximumf %66, %67 : vector<8x1xf32>
    %69 = vector.broadcast %68 : vector<8x1xf32> to vector<8x64xf32>
    %70 = arith.divf %56, %69 : vector<8x64xf32>
    %71 = vector.broadcast %51 : vector<1x64xf32> to vector<8x64xf32>
    %72 = arith.mulf %70, %71 : vector<8x64xf32>
    %73 = arith.mulf %59, %59 : vector<24x64xf32>
    %cst_46 = arith.constant dense<0.000000e+00> : vector<24xf32>
    %74 = vector.multi_reduction <add>, %73, %cst_46 [1] : vector<24x64xf32> to vector<24xf32>
    %75 = vector.shape_cast %74 : vector<24xf32> to vector<24x1xf32>
    %76 = math.sqrt %75 : vector<24x1xf32>
    %cst_47 = arith.constant 9.99999996E-13 : f32
    %77 = vector.broadcast %cst_47 : f32 to vector<24x1xf32>
    %78 = arith.maximumf %76, %77 : vector<24x1xf32>
    %79 = vector.broadcast %78 : vector<24x1xf32> to vector<24x64xf32>
    %80 = arith.divf %59, %79 : vector<24x64xf32>
    %81 = vector.broadcast %52 : vector<1x64xf32> to vector<24x64xf32>
    %82 = arith.mulf %80, %81 : vector<24x64xf32>
    %cst_48 = arith.constant dense<0.000000e+00> : vector<8x24xf32>
    %83 = tpu.matmul %72, %82, %cst_48 {dimension_numbers = #tpu.dot_dimension_numbers<[1], [1], [0], [0], [0, 0, 1, 0], [], []>} : vector<8x64xf32>, vector<24x64xf32>, vector<8x24xf32> -> vector<8x24xf32>
    %cst_49 = arith.constant 8.000000e+00 : f32
    %84 = vector.broadcast %cst_49 : f32 to vector<8x24xf32>
    %85 = arith.mulf %83, %84 : vector<8x24xf32>
    %cst_50 = arith.constant dense<0xFF800000> : vector<8xf32>
    %86 = vector.multi_reduction <maximumf>, %85, %cst_50 [1] : vector<8x24xf32> to vector<8xf32>
    %87 = vector.shape_cast %86 : vector<8xf32> to vector<8x1xf32>
    %88 = vector.broadcast %87 : vector<8x1xf32> to vector<8x24xf32>
    %89 = arith.subf %85, %88 : vector<8x24xf32>
    %90 = math.exp %89 : vector<8x24xf32>
    %cst_51 = arith.constant dense<0.000000e+00> : vector<8xf32>
    %91 = vector.multi_reduction <add>, %90, %cst_51 [1] : vector<8x24xf32> to vector<8xf32>
    %92 = vector.shape_cast %91 : vector<8xf32> to vector<8x1xf32>
    %93 = vector.broadcast %92 : vector<8x1xf32> to vector<8x24xf32>
    %94 = arith.divf %90, %93 : vector<8x24xf32>
    %cst_52 = arith.constant dense<0.000000e+00> : vector<8x64xf32>
    %95 = tpu.matmul %94, %62, %cst_52 {dimension_numbers = #tpu.dot_dimension_numbers<[1], [0], [0], [1], [0, 0, 1, 1], [], []>} : vector<8x24xf32>, vector<24x64xf32>, vector<8x64xf32> -> vector<8x64xf32>
    %c0_53 = arith.constant 0 : index
    %c0_54 = arith.constant 0 : index
    %c0_55 = arith.constant 0 : index
    %96 = vector.load %arg10[%c0_53, %c0_54, %c0_55] : memref<2x64x128xf32, #tpu.memory_space<vmem>>, vector<1x64x128xf32>
    %97 = vector.shape_cast %96 : vector<1x64x128xf32> to vector<64x128xf32>
    %cst_56 = arith.constant dense<0.000000e+00> : vector<8x128xf32>
    %98 = tpu.matmul %95, %97, %cst_56 {dimension_numbers = #tpu.dot_dimension_numbers<[1], [0], [0], [1], [0, 0, 1, 1], [], []>} : vector<8x64xf32>, vector<64x128xf32>, vector<8x128xf32> -> vector<8x128xf32>
    %99 = arith.addf %53, %98 : vector<8x128xf32>
    %c1 = arith.constant 1 : index
    %c0_57 = arith.constant 0 : index
    %c0_58 = arith.constant 0 : index
    %100 = vector.load %arg7[%c1, %c0_57, %c0_58] : memref<2x128x64xf32, #tpu.memory_space<vmem>>, vector<1x128x64xf32>
    %101 = vector.shape_cast %100 : vector<1x128x64xf32> to vector<128x64xf32>
    %cst_59 = arith.constant dense<0.000000e+00> : vector<8x64xf32>
    %102 = tpu.matmul %47, %101, %cst_59 {dimension_numbers = #tpu.dot_dimension_numbers<[1], [0], [0], [1], [0, 0, 1, 1], [], []>} : vector<8x128xf32>, vector<128x64xf32>, vector<8x64xf32> -> vector<8x64xf32>
    %c1_60 = arith.constant 1 : index
    %c0_61 = arith.constant 0 : index
    %c0_62 = arith.constant 0 : index
    %103 = vector.load %arg8[%c1_60, %c0_61, %c0_62] : memref<2x128x64xf32, #tpu.memory_space<vmem>>, vector<1x128x64xf32>
    %104 = vector.shape_cast %103 : vector<1x128x64xf32> to vector<128x64xf32>
    %cst_63 = arith.constant dense<0.000000e+00> : vector<24x64xf32>
    %105 = tpu.matmul %50, %104, %cst_63 {dimension_numbers = #tpu.dot_dimension_numbers<[1], [0], [0], [1], [0, 0, 1, 1], [], []>} : vector<24x128xf32>, vector<128x64xf32>, vector<24x64xf32> -> vector<24x64xf32>
    %c1_64 = arith.constant 1 : index
    %c0_65 = arith.constant 0 : index
    %c0_66 = arith.constant 0 : index
    %106 = vector.load %arg9[%c1_64, %c0_65, %c0_66] : memref<2x128x64xf32, #tpu.memory_space<vmem>>, vector<1x128x64xf32>
    %107 = vector.shape_cast %106 : vector<1x128x64xf32> to vector<128x64xf32>
    %cst_67 = arith.constant dense<0.000000e+00> : vector<24x64xf32>
    %108 = tpu.matmul %50, %107, %cst_67 {dimension_numbers = #tpu.dot_dimension_numbers<[1], [0], [0], [1], [0, 0, 1, 1], [], []>} : vector<24x128xf32>, vector<128x64xf32>, vector<24x64xf32> -> vector<24x64xf32>
    %109 = arith.mulf %102, %102 : vector<8x64xf32>
    %cst_68 = arith.constant dense<0.000000e+00> : vector<8xf32>
    %110 = vector.multi_reduction <add>, %109, %cst_68 [1] : vector<8x64xf32> to vector<8xf32>
    %111 = vector.shape_cast %110 : vector<8xf32> to vector<8x1xf32>
    %112 = math.sqrt %111 : vector<8x1xf32>
    %cst_69 = arith.constant 9.99999996E-13 : f32
    %113 = vector.broadcast %cst_69 : f32 to vector<8x1xf32>
    %114 = arith.maximumf %112, %113 : vector<8x1xf32>
    %115 = vector.broadcast %114 : vector<8x1xf32> to vector<8x64xf32>
    %116 = arith.divf %102, %115 : vector<8x64xf32>
    %117 = vector.broadcast %51 : vector<1x64xf32> to vector<8x64xf32>
    %118 = arith.mulf %116, %117 : vector<8x64xf32>
    %119 = arith.mulf %105, %105 : vector<24x64xf32>
    %cst_70 = arith.constant dense<0.000000e+00> : vector<24xf32>
    %120 = vector.multi_reduction <add>, %119, %cst_70 [1] : vector<24x64xf32> to vector<24xf32>
    %121 = vector.shape_cast %120 : vector<24xf32> to vector<24x1xf32>
    %122 = math.sqrt %121 : vector<24x1xf32>
    %cst_71 = arith.constant 9.99999996E-13 : f32
    %123 = vector.broadcast %cst_71 : f32 to vector<24x1xf32>
    %124 = arith.maximumf %122, %123 : vector<24x1xf32>
    %125 = vector.broadcast %124 : vector<24x1xf32> to vector<24x64xf32>
    %126 = arith.divf %105, %125 : vector<24x64xf32>
    %127 = vector.broadcast %52 : vector<1x64xf32> to vector<24x64xf32>
    %128 = arith.mulf %126, %127 : vector<24x64xf32>
    %cst_72 = arith.constant dense<0.000000e+00> : vector<8x24xf32>
    %129 = tpu.matmul %118, %128, %cst_72 {dimension_numbers = #tpu.dot_dimension_numbers<[1], [1], [0], [0], [0, 0, 1, 0], [], []>} : vector<8x64xf32>, vector<24x64xf32>, vector<8x24xf32> -> vector<8x24xf32>
    %cst_73 = arith.constant 8.000000e+00 : f32
    %130 = vector.broadcast %cst_73 : f32 to vector<8x24xf32>
    %131 = arith.mulf %129, %130 : vector<8x24xf32>
    %cst_74 = arith.constant dense<0xFF800000> : vector<8xf32>
    %132 = vector.multi_reduction <maximumf>, %131, %cst_74 [1] : vector<8x24xf32> to vector<8xf32>
    %133 = vector.shape_cast %132 : vector<8xf32> to vector<8x1xf32>
    %134 = vector.broadcast %133 : vector<8x1xf32> to vector<8x24xf32>
    %135 = arith.subf %131, %134 : vector<8x24xf32>
    %136 = math.exp %135 : vector<8x24xf32>
    %cst_75 = arith.constant dense<0.000000e+00> : vector<8xf32>
    %137 = vector.multi_reduction <add>, %136, %cst_75 [1] : vector<8x24xf32> to vector<8xf32>
    %138 = vector.shape_cast %137 : vector<8xf32> to vector<8x1xf32>
    %139 = vector.broadcast %138 : vector<8x1xf32> to vector<8x24xf32>
    %140 = arith.divf %136, %139 : vector<8x24xf32>
    %cst_76 = arith.constant dense<0.000000e+00> : vector<8x64xf32>
    %141 = tpu.matmul %140, %108, %cst_76 {dimension_numbers = #tpu.dot_dimension_numbers<[1], [0], [0], [1], [0, 0, 1, 1], [], []>} : vector<8x24xf32>, vector<24x64xf32>, vector<8x64xf32> -> vector<8x64xf32>
    %c1_77 = arith.constant 1 : index
    %c0_78 = arith.constant 0 : index
    %c0_79 = arith.constant 0 : index
    %142 = vector.load %arg10[%c1_77, %c0_78, %c0_79] : memref<2x64x128xf32, #tpu.memory_space<vmem>>, vector<1x64x128xf32>
    %143 = vector.shape_cast %142 : vector<1x64x128xf32> to vector<64x128xf32>
    %cst_80 = arith.constant dense<0.000000e+00> : vector<8x128xf32>
    %144 = tpu.matmul %141, %143, %cst_80 {dimension_numbers = #tpu.dot_dimension_numbers<[1], [0], [0], [1], [0, 0, 1, 1], [], []>} : vector<8x64xf32>, vector<64x128xf32>, vector<8x128xf32> -> vector<8x128xf32>
    %145 = arith.addf %99, %144 : vector<8x128xf32>
    %c0_81 = arith.constant 0 : index
    %c0_82 = arith.constant 0 : index
    %146 = vector.load %arg13[%c0_81, %c0_82] : memref<1x128xf32, #tpu.memory_space<vmem>>, vector<1x128xf32>
    %c0_83 = arith.constant 0 : index
    %c0_84 = arith.constant 0 : index
    %147 = vector.load %arg14[%c0_83, %c0_84] : memref<1x128xf32, #tpu.memory_space<vmem>>, vector<1x128xf32>
    %cst_85 = arith.constant dense<0.000000e+00> : vector<8xf32>
    %148 = vector.multi_reduction <add>, %145, %cst_85 [1] : vector<8x128xf32> to vector<8xf32>
    %149 = vector.shape_cast %148 : vector<8xf32> to vector<8x1xf32>
    %cst_86 = arith.constant 1.280000e+02 : f32
    %150 = vector.broadcast %cst_86 : f32 to vector<8x1xf32>
    %151 = arith.divf %149, %150 : vector<8x1xf32>
    %152 = vector.broadcast %151 : vector<8x1xf32> to vector<8x128xf32>
    %153 = arith.subf %145, %152 : vector<8x128xf32>
    %154 = arith.mulf %153, %153 : vector<8x128xf32>
    %cst_87 = arith.constant dense<0.000000e+00> : vector<8xf32>
    %155 = vector.multi_reduction <add>, %154, %cst_87 [1] : vector<8x128xf32> to vector<8xf32>
    %156 = vector.shape_cast %155 : vector<8xf32> to vector<8x1xf32>
    %cst_88 = arith.constant 1.280000e+02 : f32
    %157 = vector.broadcast %cst_88 : f32 to vector<8x1xf32>
    %158 = arith.divf %156, %157 : vector<8x1xf32>
    %cst_89 = arith.constant 9.99999974E-6 : f32
    %159 = vector.broadcast %cst_89 : f32 to vector<8x1xf32>
    %160 = arith.addf %158, %159 : vector<8x1xf32>
    %161 = math.rsqrt %160 : vector<8x1xf32>
    %162 = vector.broadcast %161 : vector<8x1xf32> to vector<8x128xf32>
    %163 = arith.mulf %153, %162 : vector<8x128xf32>
    %164 = vector.broadcast %146 : vector<1x128xf32> to vector<8x128xf32>
    %165 = arith.mulf %163, %164 : vector<8x128xf32>
    %166 = vector.broadcast %147 : vector<1x128xf32> to vector<8x128xf32>
    %167 = arith.addf %165, %166 : vector<8x128xf32>
    %c0_90 = arith.constant 0 : index
    %c0_91 = arith.constant 0 : index
    %c0_92 = arith.constant 0 : index
    %168 = vector.load %arg15[%c0_90, %c0_91, %c0_92] : memref<1x8x128xf32, #tpu.memory_space<vmem>>, vector<1x8x128xf32>
    %169 = vector.shape_cast %168 : vector<1x8x128xf32> to vector<8x128xf32>
    %170 = vector.shape_cast %167 : vector<8x128xf32> to vector<1x8x128xf32>
    tpu.vector_store %arg15[%c0_90, %c0_91, %c0_92], %170 {strides = array<i32>} : memref<1x8x128xf32, #tpu.memory_space<vmem>>, vector<1x8x128xf32>,
    return
  }
  func.func @transform_0(%arg0: i32) -> (i32, i32, i32) {
    %c0_i32 = arith.constant 0 : i32
    %c0_i32_0 = arith.constant 0 : i32
    %c0_i32_1 = arith.constant 0 : i32
    return %arg0, %c0_i32, %c0_i32_0 : i32, i32, i32
  }
  func.func @transform_1(%arg0: i32) -> (i32, i32, i32) {
    %c0_i32 = arith.constant 0 : i32
    %c0_i32_0 = arith.constant 0 : i32
    %c0_i32_1 = arith.constant 0 : i32
    return %arg0, %c0_i32, %c0_i32_0 : i32, i32, i32
  }
  func.func @transform_2(%arg0: i32) -> (i32, i32) {
    %c0_i32 = arith.constant 0 : i32
    %c0_i32_0 = arith.constant 0 : i32
    %c0_i32_1 = arith.constant 0 : i32
    return %c0_i32, %c0_i32_0 : i32, i32
  }
  func.func @transform_3(%arg0: i32) -> (i32, i32) {
    %c0_i32 = arith.constant 0 : i32
    %c0_i32_0 = arith.constant 0 : i32
    %c0_i32_1 = arith.constant 0 : i32
    return %c0_i32, %c0_i32_0 : i32, i32
  }
  func.func @transform_4(%arg0: i32) -> (i32, i32) {
    %c0_i32 = arith.constant 0 : i32
    %c0_i32_0 = arith.constant 0 : i32
    %c0_i32_1 = arith.constant 0 : i32
    return %c0_i32, %c0_i32_0 : i32, i32
  }
  func.func @transform_5(%arg0: i32) -> (i32, i32) {
    %c0_i32 = arith.constant 0 : i32
    %c0_i32_0 = arith.constant 0 : i32
    %c0_i32_1 = arith.constant 0 : i32
    return %c0_i32, %c0_i32_0 : i32, i32
  }
  func.func @transform_6(%arg0: i32) -> (i32, i32, i32) {
    %c0_i32 = arith.constant 0 : i32
    %c0_i32_0 = arith.constant 0 : i32
    %c0_i32_1 = arith.constant 0 : i32
    %c0_i32_2 = arith.constant 0 : i32
    return %c0_i32, %c0_i32_0, %c0_i32_1 : i32, i32, i32
  }
  func.func @transform_7(%arg0: i32) -> (i32, i32, i32) {
    %c0_i32 = arith.constant 0 : i32
    %c0_i32_0 = arith.constant 0 : i32
    %c0_i32_1 = arith.constant 0 : i32
    %c0_i32_2 = arith.constant 0 : i32
    return %c0_i32, %c0_i32_0, %c0_i32_1 : i32, i32, i32
  }
  func.func @transform_8(%arg0: i32) -> (i32, i32, i32) {
    %c0_i32 = arith.constant 0 : i32
    %c0_i32_0 = arith.constant 0 : i32
    %c0_i32_1 = arith.constant 0 : i32
    %c0_i32_2 = arith.constant 0 : i32
    return %c0_i32, %c0_i32_0, %c0_i32_1 : i32, i32, i32
  }
  func.func @transform_9(%arg0: i32) -> (i32, i32, i32) {
    %c0_i32 = arith.constant 0 : i32
    %c0_i32_0 = arith.constant 0 : i32
    %c0_i32_1 = arith.constant 0 : i32
    %c0_i32_2 = arith.constant 0 : i32
    return %c0_i32, %c0_i32_0, %c0_i32_1 : i32, i32, i32
  }
  func.func @transform_10(%arg0: i32) -> (i32, i32) {
    %c0_i32 = arith.constant 0 : i32
    %c0_i32_0 = arith.constant 0 : i32
    %c0_i32_1 = arith.constant 0 : i32
    return %c0_i32, %c0_i32_0 : i32, i32
  }
  func.func @transform_11(%arg0: i32) -> (i32, i32) {
    %c0_i32 = arith.constant 0 : i32
    %c0_i32_0 = arith.constant 0 : i32
    %c0_i32_1 = arith.constant 0 : i32
    return %c0_i32, %c0_i32_0 : i32, i32
  }
  func.func @transform_12(%arg0: i32) -> (i32, i32) {
    %c0_i32 = arith.constant 0 : i32
    %c0_i32_0 = arith.constant 0 : i32
    %c0_i32_1 = arith.constant 0 : i32
    return %c0_i32, %c0_i32_0 : i32, i32
  }
  func.func @transform_13(%arg0: i32) -> (i32, i32) {
    %c0_i32 = arith.constant 0 : i32
    %c0_i32_0 = arith.constant 0 : i32
    %c0_i32_1 = arith.constant 0 : i32
    return %c0_i32, %c0_i32_0 : i32, i32
  }
  func.func @transform_14(%arg0: i32) -> (i32, i32, i32) {
    %c0_i32 = arith.constant 0 : i32
    %c0_i32_0 = arith.constant 0 : i32
    %c0_i32_1 = arith.constant 0 : i32
    return %arg0, %c0_i32, %c0_i32_0 : i32, i32, i32
  }
}

</mosaic_0001>

<bundles_post_ra>
// kernel: tpu_custom_call.1
= control target key start
LH: loop header
LB: loop body
LE: loop exit
PB: predicated region body
PF: predicated region fallthrough
CT: control target
= control target key end

     0   :  { %19 = vsyncpa [#allocation4], 0  ;;  %s3516_s0 = inlined_call_operand.vmem [shape: f32[2,16,128], index: 0, kind: input, shape index: {}]   ;;  %s3517_s1 = inlined_call_operand.vmem [shape: f32[2,8,128], index: 1, kind: input, shape index: {}]   ;;  %s3518_s2 = inlined_call_operand.vmem [shape: f32[1,128], index: 2, kind: input, shape index: {}]   ;;  %s3519_s3 = inlined_call_operand.vmem [shape: f32[1,128], index: 3, kind: input, shape index: {}]   ;;  %s3520_s4 = inlined_call_operand.vmem [shape: f32[1,128], index: 4, kind: input, shape index: {}]   ;;  %s3521_s5 = inlined_call_operand.vmem [shape: f32[1,128], index: 5, kind: input, shape index: {}]   ;;  %s3522_s6 = inlined_call_operand.vmem [shape: f32[2,128,64], index: 6, kind: input, shape index: {}]   ;;  %s3523_s7 = inlined_call_operand.vmem [shape: f32[2,128,64], index: 7, kind: input, shape index: {}]   ;;  %s3524_s8 = inlined_call_operand.vmem [shape: f32[2,128,64], index: 8, kind: input, shape index: {}]   ;;  %s3525_s9 = inlined_call_operand.vmem [shape: f32[2,64,128], index: 9, kind: input, shape index: {}]   ;;  %s3526_s10 = inlined_call_operand.vmem [shape: f32[1,64], index: 10, kind: input, shape index: {}]   ;;  %s3527_s11 = inlined_call_operand.vmem [shape: f32[1,64], index: 11, kind: input, shape index: {}]   ;;  %s3528_s12 = inlined_call_operand.vmem [shape: f32[1,128], index: 12, kind: input, shape index: {}]   ;;  %s3529_s13 = inlined_call_operand.vmem [shape: f32[1,128], index: 13, kind: input, shape index: {}]   ;;  %s3530_s14 = inlined_call_operand.hbm [shape: f32[2,8,128], index: 14, kind: output, shape index: {}]  }
   0x1   :  { %21 = vsyncpa [#allocation4 + $0x1], 0  ;;  %s2822_s29 = smov 0   ;;  %s2824_s30 = smov 0  }
   0x2   :  { %s2826_s15 = smov 0   ;;  %s2828_s16 = smov 0  }
   0x3 LB: > { %3536 = sst [smem:[#allocation6_spill]] %s2729_s29  ;;  %s2843_s17 = sadd.s32 4294967295, %s2741_s16   ;;  %s2741_s16 = sphi %s2828_s16, %s3547_s16   ;;  %s2737_s15 = sphi %s2826_s15, %s3549_s15   ;;  %s2733_s30 = sphi %s2824_s30, %s3551_s30   ;;  %s2729_s29 = sphi %s2822_s29, %s3550_s29  }
   0x4   : > { %3537 = sst [smem:[#allocation7_spill]] %s2737_s15  ;;  %s1865_s18 = sadd.s32 4294967294, %s2741_s16  }
   0x5   : > { %s2847_s19 = sadd.s32 1, %s2741_s16   ;;  %s338_s20 = sadd.s32 1, %s2737_s15 }
   0x6   : > { %3538 = sst [smem:[#allocation8_spill]] %s2847_s19  ;;  %s335_s21 = ssub.s32 %s2741_s16, %s2847_s19 }
   0x7   : > { %p348_p0 = scmp.ne.s32.totalorder %s2737_s15, %s2733_s30  ;;  %p336_p1 = scmp.eq.s32.totalorder %s335_s21, 0 }
   0x8   : > { %p349_p2 = scmp.eq.s32.totalorder %s2843_s17, 1  ;;  %p354_p3 = scmp.ne.s32.totalorder %s2733_s30, %s2729_s29 }
   0x9   : > { %p355_p4 = scmp.eq.s32.totalorder %s1865_s18, 1  ;;  %p1868_p7 = scmp.ge.s32.totalorder %s2741_s16, 1 }
   0xa   : > { %s2858_s22 = scalar_select %p336_p1, %s2737_s15, %s338_s20  }
   0xb   : > { %p2860_p5 = por %p349_p2, %p348_p0  ;;  %p2864_p6 = por %p355_p4, %p354_p3 }
   0xc   : > { %3539 = sst [smem:[#allocation9_spill]] %s2858_s22  ;;  %p424_p8 = scmp.lt.s32.totalorder %s2741_s16, 3 }
   0xd   : > { %s3541_s24 = scalar_select %p2864_p6, 1, 0 }
   0xe   : > { %p425_p9 = pnand %p1868_p7, %p424_p8 }
   0xf   : > { %3542 = sst [smem:[#allocation10_spill]] %s3541_s24  ;;  %p474_p10 = scmp.lt.s32.totalorder (!%p425_p9), %s2843_s17, 1  ;;  %v648_v3 = vld [vmem:[%s3523_s7] sm:$0xff] (!%p425_p9)  ;;  %v649_v4 = vld [vmem:[%s3523_s7 + $0x8] sm:$0xff] (!%p425_p9)  ;;  %v2743_v6 = vmov (!%p425_p9), 0.0|0.0   ;;  %v650_v9 = vld [vmem:[%s3523_s7 + $0x10] sm:$0xff] (!%p425_p9) }
  0x10   : > { %428 = sbr.rel (%p425_p9) target bundleno = 2974 (0xb9e), region = 76  ;;  %v562_v5 = vld [vmem:[%s3522_s6] sm:$0xff] (!%p425_p9)  ;;  %2430 = vmatprep.subr.bf16.mxu1 (!%p425_p9), %v2743_v6  ;;  %v2431_v7 = vpack.c.bf16 (!%p425_p9), %v649_v4, %v648_v3  ;;  %2406 = vmatprep.subr.bf16.mxu0 (!%p425_p9), %v2743_v6  ;;  %v563_v8 = vld [vmem:[%s3522_s6 + $0x8] sm:$0xff] (!%p425_p9)  ;;  %v651_v10 = vld [vmem:[%s3523_s7 + $0x18] sm:$0xff] (!%p425_p9)  ;;  %vm2744_vm0 = vmmov (!%p425_p9), 0   ;;  %vm841_vm1 = vcmask (!%p425_p9), 523264  }
  0x11   : > { %v2407_v11 = vpack.c.bf16 (!%p425_p9), %v563_v8, %v562_v5  ;;  %v564_v12 = vld [vmem:[%s3522_s6 + $0x10] sm:$0xff] (!%p425_p9)  ;;  %v565_v13 = vld [vmem:[%s3522_s6 + $0x18] sm:$0xff] (!%p425_p9)  ;;  %v2434_v14 = vpack.c.bf16 (!%p425_p9), %v651_v10, %v650_v9  ;;  %v652_v16 = vld [vmem:[%s3523_s7 + $0x20] sm:$0xff] (!%p425_p9)  ;;  %vm996_vm11 = vcmask (!%p425_p9), 195584   ;;  %s471_s19 = sand.u32 (!%p425_p9), 1, %s2733_s30   ;;  %s1950_s21 = sshll.u32 (!%p425_p9), %s2843_s17, 7 }
  0x12   : > { %2432 = vmatpush3.bf16.msra.mxu1 (!%p425_p9), %v2431_v7  ;;  %v2410_v15 = vpack.c.bf16 (!%p425_p9), %v565_v13, %v564_v12  ;;  %v653_v17 = vld [vmem:[%s3523_s7 + $0x28] sm:$0xff] (!%p425_p9)  ;;  %v566_v31 = vld [vmem:[%s3522_s6 + $0x20] sm:$0xff] (!%p425_p9)  ;;  %v654_v34 = vld [vmem:[%s3523_s7 + $0x30] sm:$0xff] (!%p425_p9)  ;;  %s1869_s24 = sshll.u32 (!%p425_p9), %s471_s19, 3  ;;  %s3474_s22 = scalar_lea.hbm (!%p425_p9), %s3530_s14, %s1950_s21 }
  0x13   : > { %2408 = vmatpush3.bf16.msra.mxu0 (!%p425_p9), %v2407_v11  ;;  %2433 = vmatprep.subr.bf16.mxu1 (!%p425_p9), %v2743_v6  ;;  %v2437_v18 = vpack.c.bf16 (!%p425_p9), %v653_v17, %v652_v16  ;;  %v567_v32 = vld [vmem:[%s3522_s6 + $0x28] sm:$0xff] (!%p425_p9)  ;;  %v655_v35 = vld [vmem:[%s3523_s7 + $0x38] sm:$0xff] (!%p425_p9)  ;;  %v568_v37 = vld [vmem:[%s3522_s6 + $0x30] sm:$0xff] (!%p425_p9)  ;;  %s1781_s29 = scalar_lea.sflag (!%p425_p9), [#allocation4], %s471_s19 }
  0x14   : > { %2409 = vmatprep.subr.bf16.mxu0 (!%p425_p9), %v2743_v6  ;;  %v2413_v33 = vpack.c.bf16 (!%p425_p9), %v567_v32, %v566_v31  ;;  %v2440_v36 = vpack.c.bf16 (!%p425_p9), %v655_v35, %v654_v34  ;;  %v569_v38 = vld [vmem:[%s3522_s6 + $0x38] sm:$0xff] (!%p425_p9)  ;;  %v656_v40 = vld [vmem:[%s3523_s7 + $0x40] sm:$0xff] (!%p425_p9)  ;;  %v657_v41 = vld [vmem:[%s3523_s7 + $0x48] sm:$0xff] (!%p425_p9) }
  0x15   : > { %v2416_v39 = vpack.c.bf16 (!%p425_p9), %v569_v38, %v568_v37  ;;  %v2443_v42 = vpack.c.bf16 (!%p425_p9), %v657_v41, %v656_v40  ;;  %v570_v43 = vld [vmem:[%s3522_s6 + $0x40] sm:$0xff] (!%p425_p9)  ;;  %v571_v44 = vld [vmem:[%s3522_s6 + $0x48] sm:$0xff] (!%p425_p9)  ;;  %v658_v46 = vld [vmem:[%s3523_s7 + $0x50] sm:$0xff] (!%p425_p9) }
  0x16   : > { %2435 = vmatpush3.bf16.msra.mxu1 (!%p425_p9), %v2434_v14  ;;  %v2419_v45 = vpack.c.bf16 (!%p425_p9), %v571_v44, %v570_v43  ;;  %v659_v47 = vld [vmem:[%s3523_s7 + $0x58] sm:$0xff] (!%p425_p9)  ;;  %v572_v49 = vld [vmem:[%s3522_s6 + $0x50] sm:$0xff] (!%p425_p9)  ;;  %v660_v52 = vld [vmem:[%s3523_s7 + $0x60] sm:$0xff] (!%p425_p9) }
  0x17   : > { %s475_s25 = scalar_select %p474_p10, %s2843_s17, 1  ;;  %2411 = vmatpush3.bf16.msra.mxu0 %v2410_v15  ;;  %2436 = vmatprep.subr.bf16.mxu1 %v2743_v6  ;;  %v2446_v48 = vpack.c.bf16 %v659_v47, %v658_v46  ;;  %v573_v50 = vld [vmem:[%s3522_s6 + $0x58] sm:$0xff]  ;;  %v661_v53 = vld [vmem:[%s3523_s7 + $0x68] sm:$0xff]  ;;  %v574_v55 = vld [vmem:[%s3522_s6 + $0x60] sm:$0xff] }
  0x18   : > { %2412 = vmatprep.subr.bf16.mxu0 %v2743_v6  ;;  %v2422_v51 = vpack.c.bf16 %v573_v50, %v572_v49  ;;  %v2449_v54 = vpack.c.bf16 %v661_v53, %v660_v52  ;;  %v575_v56 = vld [vmem:[%s3522_s6 + $0x68] sm:$0xff]  ;;  %v662_v58 = vld [vmem:[%s3523_s7 + $0x70] sm:$0xff]  ;;  %v663_v59 = vld [vmem:[%s3523_s7 + $0x78] sm:$0xff]  ;;  %s2746_s17 = smov [#allocation3]  }
  0x19   : > { %s1953_s26 = sshll.u32 %s475_s25, 4  ;;  %s1872_s27 = sshll.u32 %s475_s25, 3  ;;  %v2425_v57 = vpack.c.bf16 %v575_v56, %v574_v55  ;;  %v2452_v60 = vpack.c.bf16 %v663_v59, %v662_v58  ;;  %v576_v61 = vld [vmem:[%s3522_s6 + $0x70] sm:$0xff]  ;;  %v577_v62 = vld [vmem:[%s3522_s6 + $0x78] sm:$0xff]  ;;  %v1873_v12 = vld [vmem:[%s3518_s2] ss:$0 sm:$0xff] }
  0x1a   : > { %s478_s20 = scalar_lea.vmem %s3516_s0, %s1953_s26  ;;  %s482_s15 = scalar_lea.vmem %s3517_s1, %s1872_s27  ;;  %2438 = vmatpush3.bf16.msra.mxu1 %v2437_v18  ;;  %v2428_v63 = vpack.c.bf16 %v577_v62, %v576_v61  ;;  %v1874_v14 = vld [vmem:[%s3519_s3] ss:$0 sm:$0xff]  ;;  %v747_v31 = vld [vmem:[%s3524_s8 + $0x18] sm:$0xff]  ;;  %v749_v34 = vld [vmem:[%s3524_s8 + $0x28] sm:$0xff] }
  0x1b   : > { %v483_v0 = vld [vmem:[%s478_s20] sm:$0xff]  ;;  %v484_v2 = vld [vmem:[%s478_s20 + $0x8] sm:$0xff]  ;;  %2439 = vmatprep.subr.bf16.mxu1 %v2743_v6  ;;  %2414 = vmatpush3.bf16.msra.mxu0 %v2413_v33  ;;  %v751_v37 = vld [vmem:[%s3524_s8 + $0x38] sm:$0xff]  ;;  %s473_s25 = scalar_lea.vmem [#allocation3], %s1869_s24  ;;  %s2683_s24 = sshll.u32 %s2746_s17, 4  ;;  %s2684_s24 = int_to_ptr.vmem [resolvable:$false] %s2683_s24 }
  0x1c   : > { %v526_v1 = vld [vmem:[%s482_s15] sm:$0xff]  ;;  %487 = vadd.xlane.f32.xlu0 %v483_v0  ;;  %2415 = vmatprep.subr.bf16.mxu0 %v2743_v6  ;;  %v753_v40 = vld [vmem:[%s3524_s8 + $0x48] sm:$0xff]  ;;  %v755_v43 = vld [vmem:[%s3524_s8 + $0x58] sm:$0xff]  ;;  %s1794_s28 = sshll.u32 %s473_s25, 4  ;;  %s2685_s18 = scalar_lea.vmem %s2684_s24, 256  ;;  %s3476_s28 = int_to_ptr.vmem [resolvable:$true] %s1794_s28 }
  0x1d   : > { %529 = vadd.xlane.f32.xlu1 %v526_v1  ;;  %v1875_v17 = vld [vmem:[%s3520_s4] ss:$0 sm:$0xff]  ;;  %v757_v46 = vld [vmem:[%s3524_s8 + $0x68] sm:$0xff]  ;;  %v759_v49 = vld [vmem:[%s3524_s8 + $0x78] sm:$0xff]  ;;  %s2679_s27 = scalar_lea.vmem %s3476_s28, 128  ;;  %p2686_p0 = scmp.lt.s32.totalorder %s3476_s28, %s2684_s24 }
  0x1e   : > { %2441 = vmatpush3.bf16.msra.mxu1 %v2440_v36  ;;  %v748_v33 = vld [vmem:[%s3524_s8 + $0x20] sm:$0xff]  ;;  %v750_v36 = vld [vmem:[%s3524_s8 + $0x30] sm:$0xff]  ;;  %v1901_v52 = vld [vmem:[%s3523_s7 + $0x88] sm:$0xff]  ;;  %p2680_p11 = scmp.ne.s32.totalorder %s3476_s28, %s2679_s27  ;;  %p2687_p1 = scmp.lt.s32.totalorder %s2685_s18, %s2679_s27 }
  0x1f   : > { %2442 = vmatprep.subr.bf16.mxu1 %v2743_v6  ;;  %2417 = vmatpush3.bf16.msra.mxu0 %v2416_v39  ;;  %v2461_v35 = vpack.c.bf16 %v749_v34, %v748_v33  ;;  %v2464_v38 = vpack.c.bf16 %v751_v37, %v750_v36  ;;  %v752_v39 = vld [vmem:[%s3524_s8 + $0x40] sm:$0xff]  ;;  %v1903_v55 = vld [vmem:[%s3523_s7 + $0x98] sm:$0xff]  ;;  %v1905_v58 = vld [vmem:[%s3523_s7 + $0xa8] sm:$0xff] }
  0x20   : > { %489 = vadd.xlane.f32.xlu0 %v484_v2  ;;  %2418 = vmatprep.subr.bf16.mxu0 %v2743_v6  ;;  %v2467_v41 = vpack.c.bf16 %v753_v40, %v752_v39  ;;  %v1907_v61 = vld [vmem:[%s3523_s7 + $0xb8] sm:$0xff]  ;;  %vm3216_vm10 = vmpackc.low %vm841_vm1, %vm841_vm1  ;;  %p2681_p12 = pnand %p2680_p11, %p2860_p5  ;;  %p2688_p2 = por %p2687_p1, %p2686_p0 }
  0x22   : > { %2444 = vmatpush3.bf16.msra.mxu1 %v2443_v42  ;;  %v754_v42 = vld [vmem:[%s3524_s8 + $0x50] sm:$0xff]  ;;  %p2682_p13 = pneg %p2681_p12 }
  0x23   : > { %2445 = vmatprep.subr.bf16.mxu1 %v2743_v6  ;;  %2420 = vmatpush3.bf16.msra.mxu0 %v2419_v45  ;;  %v2470_v44 = vpack.c.bf16 %v755_v43, %v754_v42  ;;  %v756_v45 = vld [vmem:[%s3524_s8 + $0x60] sm:$0xff] }
  0x24   : > { %2421 = vmatprep.subr.bf16.mxu0 %v2743_v6  ;;  %v2473_v47 = vpack.c.bf16 %v757_v46, %v756_v45  ;;  %p2689_p3 = pnand %p2688_p2, %p2682_p13 }
  0x26   : > { %2447 = vmatpush3.bf16.msra.mxu1 %v2446_v48  ;;  %v758_v48 = vld [vmem:[%s3524_s8 + $0x70] sm:$0xff] }
  0x27   : > { %2448 = vmatprep.subr.bf16.mxu1 %v2743_v6  ;;  %2423 = vmatpush3.bf16.msra.mxu0 %v2422_v51  ;;  %v2476_v50 = vpack.c.bf16 %v759_v49, %v758_v48  ;;  %v1900_v51 = vld [vmem:[%s3523_s7 + $0x80] sm:$0xff] }
  0x28   : > { %2424 = vmatprep.subr.bf16.mxu0 %v2743_v6  ;;  %v2510_v53 = vpack.c.bf16 %v1901_v52, %v1900_v51 }
  0x2a   : > { %2450 = vmatpush3.bf16.msra.mxu1 %v2449_v54  ;;  %v1902_v54 = vld [vmem:[%s3523_s7 + $0x90] sm:$0xff] }
  0x2b   : > { %2451 = vmatprep.subr.bf16.mxu1 %v2743_v6  ;;  %2426 = vmatpush3.bf16.msra.mxu0 %v2425_v57  ;;  %v2513_v56 = vpack.c.bf16 %v1903_v55, %v1902_v54  ;;  %v1904_v57 = vld [vmem:[%s3523_s7 + $0xa0] sm:$0xff] }
  0x2c   : > { %2427 = vmatprep.subr.bf16.mxu0 %v2743_v6  ;;  %v2516_v59 = vpack.c.bf16 %v1905_v58, %v1904_v57 }
  0x2e   : > { %2453 = vmatpush3.bf16.msra.mxu1 %v2452_v60  ;;  %v1906_v60 = vld [vmem:[%s3523_s7 + $0xb0] sm:$0xff] }
  0x2f   : > { %2429 = vmatpush3.bf16.msra.mxu0 %v2428_v63  ;;  %2478 = vmatprep.subr.bf16.mxu1 %v2743_v6  ;;  %v2519_v62 = vpack.c.bf16 %v1907_v61, %v1906_v60  ;;  %v1908_v63 = vld [vmem:[%s3523_s7 + $0xc0] sm:$0xff] }
  0x30   : > { %2454 = vmatprep.subr.bf16.mxu0 %v2743_v6 }
  0xa9   : > { %v488_v19 = vpop.xlane.xlu0 %487 }
  0xaa   : > { %v530_v20 = vpop.xlane.xlu1 %529  ;;  %v492_v21 = vmul.f32 0.0078125, %v488_v19 }
  0xab   : > { %v531_v22 = vmul.f32 0.0078125, %v530_v20 }
  0xac   : > { %v2915_v23 = vsub.f32 %v483_v0, %v492_v21  ;;  %v2745_v0 = vmov 0.0   ;;  %v744_v21 = vld [vmem:[%s3524_s8] sm:$0xff] }
  0xad   : > { %v2917_v24 = vsub.f32 %v526_v1, %v531_v22  ;;  %v490_v25 = vpop.xlane.xlu0 %489  ;;  %2165 = vmatprep.mubr.msk.f32.mxu1 %vm2744_vm0, %v2745_v0  ;;  %2130 = vmatprep.mubr.msk.f32.mxu0 %vm2744_vm0, %v2745_v0  ;;  %v745_v22 = vld [vmem:[%s3524_s8 + $0x8] sm:$0xff] }
  0xae   : > { %v493_v26 = vmul.f32 0.0078125, %v490_v25  ;;  %v496_v27 = vmul.f32 %v2915_v23, %v2915_v23 }
  0xaf   : > { %v533_v29 = vmul.f32 %v2917_v24, %v2917_v24 }
  0xb0   : > { %v2921_v28 = vsub.f32 %v484_v2, %v493_v26  ;;  %498 = vadd.xlane.f32.xlu1 %v496_v27  ;;  %v2455_v27 = vpack.c.bf16 %v745_v22, %v744_v21 }
  0xb2   : > { %v497_v30 = vmul.f32 %v2921_v28, %v2921_v28 }
  0xb4   : > { %534 = vadd.xlane.f32.xlu1 %v533_v29  ;;  %500 = vadd.xlane.f32.xlu0 %v497_v30  ;;  %v746_v30 = vld [vmem:[%s3524_s8 + $0x10] sm:$0xff] }
 0x13d   : > { %v499_v1 = vpop.xlane.xlu1 %498 }
 0x13e   : > { %v502_v2 = vmul.f32 0.0078125, %v499_v1  ;;  %v1909_v1 = vld [vmem:[%s3523_s7 + $0xc8] sm:$0xff] }
 0x140   : > { %v504_v3 = vadd.f32 1e-05, %v502_v2  ;;  %v2522_v2 = vpack.c.bf16 %v1909_v1, %v1908_v63 }
 0x141   : > { %v535_v4 = vpop.xlane.xlu1 %534  ;;  %v501_v5 = vpop.xlane.xlu0 %500 }
 0x142   : > { %2631 = vrsqrt.f32 %v504_v3  ;;  %v536_v7 = vmul.f32 0.0078125, %v535_v4  ;;  %v503_v8 = vmul.f32 0.0078125, %v501_v5  ;;  %v1910_v3 = vld [vmem:[%s3523_s7 + $0xd0] sm:$0xff]  ;;  %v1911_v4 = vld [vmem:[%s3523_s7 + $0xd8] sm:$0xff] }
 0x143   : > { %v2525_v5 = vpack.c.bf16 %v1911_v4, %v1910_v3 }
 0x144   : > { %v537_v9 = vadd.f32 1e-05, %v536_v7  ;;  %v505_v10 = vadd.f32 1e-05, %v503_v8  ;;  %v1912_v7 = vld [vmem:[%s3523_s7 + $0xe0] sm:$0xff]  ;;  %v1913_v8 = vld [vmem:[%s3523_s7 + $0xe8] sm:$0xff] }
 0x146   : > { %2633 = vrsqrt.f32 %v537_v9  ;;  %v2528_v9 = vpack.c.bf16 %v1913_v8, %v1912_v7 }
 0x147   : > { %2635 = vrsqrt.f32 %v505_v10  ;;  %v1914_v10 = vld [vmem:[%s3523_s7 + $0xf0] sm:$0xff] }
 0x14c   : > { %v2632_v11 = vpop.eup %2631 }
 0x14d   : > { %v508_v13 = vmul.f32 %v2632_v11, %v2915_v23  ;;  %v1876_v23 = vld [vmem:[%s3521_s5] ss:$0 sm:$0xff]  ;;  %v1915_v11 = vld [vmem:[%s3523_s7 + $0xf8] sm:$0xff] }
 0x14f   : > { %v516_v15 = vmul.f32 %v1873_v12, %v508_v13 }
 0x150   : > { %v2634_v16 = vpop.eup %2633 }
 0x151   : > { %v2636_v18 = vpop.eup %2635  ;;  %v539_v19 = vmul.f32 %v2634_v16, %v2917_v24  ;;  %v3019_v20 = vadd.f32 %v1874_v14, %v516_v15 }
 0x152   : > { %v509_v25 = vmul.f32 %v2636_v18, %v2921_v28  ;;  %v2458_v28 = vpack.c.bf16 %v747_v31, %v746_v30 }
 0x153   : > { %v546_v26 = vmul.f32 %v1875_v17, %v539_v19  ;;  %2166 = vmatmul.mubr.f32.vlgmr.msra.gmra.mrb[0].mxu1 %v3019_v20 }
 0x154   : > { %2168 = vmatprep.mubr.msk.f32.mxu1 %vm2744_vm0, %v2745_v0  ;;  %v517_v24 = vmul.f32 %v1873_v12, %v509_v25  ;;  %v2531_v12 = vpack.c.bf16 %v1915_v11, %v1914_v10 }
 0x155   : > { %v3034_v29 = vadd.f32 %v1876_v23, %v546_v26 }
 0x156   : > { %v3042_v32 = vadd.f32 %v1874_v14, %v517_v24 }
 0x157   : > { %2131 = vmatmul.mubr.f32.vlgmr.msra.gmra.mrb[0].mxu0 %v3034_v29 }
 0x158   : > { %2169 = vmatmul.mubr.f32.gmra.mrb[2].mxu1 %v3042_v32  ;;  %2456 = vmatpush3.bf16.msra.mxu0 %v2455_v27 }
 0x159   : > { %2171 = vmatprep.mubr.msk.f32.mxu1 %vm2744_vm0, %v2745_v0  ;;  %2457 = vmatprep.subr.bf16.mxu0 %v2743_v6 }
 0x15a   : > { %2206 = vmatprep.mubr.msk.f32.mxu0 %vm2744_vm0, %v2745_v0 }
 0x15c   : > { %2172 = vmatmul.mubr.f32.gmra.mrb[4].mxu1 %v3034_v29  ;;  %2459 = vmatpush3.bf16.msra.mxu0 %v2458_v28 }
 0x15d   : > { %2460 = vmatprep.subr.bf16.mxu0 %v2743_v6  ;;  %2221 = vmatprep.mubr.msk.f32.mxu1 %vm2744_vm0, %v2745_v0 }
 0x160   : > { %2462 = vmatpush3.bf16.msra.mxu0 %v2461_v35 }
 0x161   : > { %2463 = vmatprep.subr.bf16.mxu0 %v2743_v6 }
 0x164   : > { %2465 = vmatpush3.bf16.msra.mxu0 %v2464_v38 }
 0x165   : > { %2466 = vmatprep.subr.bf16.mxu0 %v2743_v6 }
 0x168   : > { %2468 = vmatpush3.bf16.msra.mxu0 %v2467_v41 }
 0x169   : > { %2469 = vmatprep.subr.bf16.mxu0 %v2743_v6 }
 0x16c   : > { %2471 = vmatpush3.bf16.msra.mxu0 %v2470_v44 }
 0x16d   : > { %2472 = vmatprep.subr.bf16.mxu0 %v2743_v6 }
 0x170   : > { %2474 = vmatpush3.bf16.msra.mxu0 %v2473_v47 }
 0x171   : > { %2475 = vmatprep.subr.bf16.mxu0 %v2743_v6 }
 0x174   : > { %2477 = vmatpush3.bf16.msra.mxu0 %v2476_v50 }
 0x175   : > { %2509 = vmatprep.subr.bf16.mxu0 %v2743_v6 }
 0x177   : > { %2207 = vmatmul.mubr.f32.vlgmr.msra.gmra.mrb[2].mxu0 %v3019_v20 }
 0x178   : > { %2511 = vmatpush3.bf16.msra.mxu0 %v2510_v53  ;;  %2209 = vmatprep.mubr.msk.f32.mxu0 %vm2744_vm0, %v2745_v0 }
 0x179   : > { %2512 = vmatprep.subr.bf16.mxu0 %v2743_v6 }
 0x17b   : > { %2210 = vmatmul.mubr.f32.gmra.mrb[4].mxu0 %v3042_v32 }
 0x17c   : > { %2514 = vmatpush3.bf16.msra.mxu0 %v2513_v56  ;;  %2212 = vmatprep.mubr.msk.f32.mxu0 %vm2744_vm0, %v2745_v0 }
 0x17d   : > { %2515 = vmatprep.subr.bf16.mxu0 %v2743_v6 }
 0x17f   : > { %2213 = vmatmul.mubr.f32.gmra.mrb[6].mxu0 %v3034_v29 }
 0x180   : > { %2517 = vmatpush3.bf16.msra.mxu0 %v2516_v59  ;;  %2300 = vmatprep.mubr.msk.f32.mxu0 %vm2744_vm0, %v2745_v0 }
 0x181   : > { %2518 = vmatprep.subr.bf16.mxu0 %v2743_v6 }
 0x184   : > { %2520 = vmatpush3.bf16.msra.mxu0 %v2519_v62 }
 0x185   : > { %2521 = vmatprep.subr.bf16.mxu0 %v2743_v6 }
 0x188   : > { %2523 = vmatpush3.bf16.msra.mxu0 %v2522_v2 }
 0x189   : > { %2524 = vmatprep.subr.bf16.mxu0 %v2743_v6 }
 0x18c   : > { %2526 = vmatpush3.bf16.msra.mxu0 %v2525_v5 }
 0x18d   : > { %2527 = vmatprep.subr.bf16.mxu0 %v2743_v6 }
 0x190   : > { %2529 = vmatpush3.bf16.msra.mxu0 %v2528_v9 }
 0x191   : > { %2530 = vmatprep.subr.bf16.mxu0 %v2743_v6 }
 0x194   : > { %2532 = vmatpush3.bf16.msra.mxu0 %v2531_v12 }
 0x195   : > { %2557 = vmatprep.subr.bf16.mxu0 %v2743_v6 }
 0x197   : > { %2301 = vmatmul.mubr.f32.vlgmr.msra.gmra.mrb[8].mxu0 %v3019_v20 }
 0x198   : > { %2303 = vmatprep.mubr.msk.f32.mxu0 %vm2744_vm0, %v2745_v0 }
 0x19b   : > { %2304 = vmatmul.mubr.f32.gmra.mrb[10].mxu0 %v3042_v32 }
 0x19c   : > { %2306 = vmatprep.mubr.msk.f32.mxu0 %vm2744_vm0, %v2745_v0 }
 0x19f   : > { %2307 = vmatmul.mubr.f32.gmra.mrb[12].mxu0 %v3034_v29 }
 0x1a0   : > { %2356 = vmatprep.mubr.msk.f32.mxu0 %vm2744_vm0, %v2745_v0 }
 0x226   : > { %v3171_v13 = vpop.f32.mrb[0].mxu1 }
 0x227   : > { %v862_v14 = vmul.f32 %v3171_v13, %v3171_v13  ;;  %v2167_v15 = vpop.f32.mrb[1].mxu1 }
 0x228   : > { %v3209_v15 = vld [vmem:[%s3527_s11] ss:$0 sm:$0xff] }
 0x229   : > { %v865_v16 = vsel %vm841_vm1, %v862_v14, 0.0 }
 0x22a   : > { %v3176_v17 = vpop.f32.mrb[0].mxu0  ;;  %866 = vadd.xlane.f32.xlu0 %v865_v16 }
 0x22b   : > { %v3178_v18 = vpop.f32.mrb[2].mxu1  ;;  %v2132_v19 = vpop.f32.mrb[1].mxu0  ;;  %v840_v23 = vmul.f32 %v3176_v17, %v3176_v17 }
 0x22c   : > { %v863_v21 = vmul.f32 %v3178_v18, %v3178_v18  ;;  %v2170_v22 = vpop.f32.mrb[3].mxu1 }
 0x22d   : > { %v842_v30 = vsel %vm841_vm1, %v840_v23, 0.0  ;;  %v1918_v22 = vld [vmem:[%s3524_s8 + $0x90] sm:$0xff] }
 0x22e   : > { %v868_v25 = vsel %vm841_vm1, %v863_v21, 0.0 }
 0x22f   : > { %869 = vadd.xlane.f32.xlu1 %v868_v25  ;;  %v3185_v26 = vpop.f32.mrb[4].mxu1 }
 0x230   : > { %v864_v24 = vmul.f32 %v3185_v26, %v3185_v26  ;;  %v2173_v27 = vpop.f32.mrb[5].mxu1 }
 0x232   : > { %v871_v31 = vsel %vm841_vm1, %v864_v24, 0.0 }
 0x233   : > { %843 = vadd.xlane.f32.xlu1 %v842_v30  ;;  %872 = vadd.xlane.f32.xlu0 %v871_v31  ;;  %v3229_v30 = vld [vmem:[%s3526_s10] ss:$0 sm:$0xff] }
 0x24a   : > { %v3191_v28 = vpop.f32.mrb[2].mxu0 }
 0x24b   : > { %v2208_v33 = vpop.f32.mrb[3].mxu0 }
 0x24e   : > { %v3193_v34 = vpop.f32.mrb[4].mxu0 }
 0x24f   : > { %v2483_v35 = vpack.c.bf16 %v3193_v34, %v3191_v28  ;;  %v2211_v36 = vpop.f32.mrb[5].mxu0 }
 0x252   : > { %v3197_v37 = vpop.f32.mrb[6].mxu0 }
 0x253   : > { %v2214_v38 = vpop.f32.mrb[7].mxu0 }
 0x26a   : > { %v3199_v39 = vpop.f32.mrb[8].mxu0 }
 0x26b   : > { %v2302_v40 = vpop.f32.mrb[9].mxu0  ;;  %v1385_v36 = vmul.f32 %v3199_v39, %v3199_v39 }
 0x26d   : > { %v1388_v34 = vsel %vm841_vm1, %v1385_v36, 0.0  ;;  %v1895_v36 = vld [vmem:[%s3522_s6 + $0xd8] sm:$0xff] }
 0x26e   : > { %v3201_v41 = vpop.f32.mrb[10].mxu0 }
 0x26f   : > { %v2305_v42 = vpop.f32.mrb[11].mxu0 }
 0x272   : > { %v3203_v43 = vpop.f32.mrb[12].mxu0 }
 0x273   : > { %v2308_v44 = vpop.f32.mrb[13].mxu0  ;;  %v1387_v28 = vmul.f32 %v3203_v43, %v3203_v43 }
 0x2b7   : > { %v867_v45 = vpop.xlane.xlu0 %866 }
 0x2b8   : > { %2637 = vrsqrt.f32 %v867_v45  ;;  %vm876_vm2 = vcmp.eq.f32.partialorder %v867_v45, inf  ;;  %v879_v51 = vand.u32 2147483648, %v867_v45  ;;  %vm878_vm3 = vcmp.eq.f32.partialorder %v867_v45, 0.0 }
 0x2bc   : > { %v870_v46 = vpop.xlane.xlu1 %869 }
 0x2bd   : > { %2639 = vrsqrt.f32 %v870_v46  ;;  %vm883_vm4 = vcmp.eq.f32.partialorder %v870_v46, inf  ;;  %v886_v57 = vand.u32 2147483648, %v870_v46  ;;  %vm885_vm5 = vcmp.eq.f32.partialorder %v870_v46, 0.0 }
 0x2c0   : > { %v844_v47 = vpop.xlane.xlu1 %843  ;;  %v873_v48 = vpop.xlane.xlu0 %872 }
 0x2c1   : > { %2641 = vrsqrt.f32 %v844_v47  ;;  %vm847_vm6 = vcmp.eq.f32.partialorder %v844_v47, inf  ;;  %v850_v1 = vand.u32 2147483648, %v844_v47  ;;  %vm890_vm7 = vcmp.eq.f32.partialorder %v873_v48, inf }
 0x2c2   : > { %v2638_v49 = vpop.eup %2637  ;;  %2643 = vrsqrt.f32 %v873_v48  ;;  %v893_v4 = vand.u32 2147483648, %v873_v48  ;;  %vm849_vm8 = vcmp.eq.f32.partialorder %v844_v47, 0.0  ;;  %vm892_vm9 = vcmp.eq.f32.partialorder %v873_v48, 0.0 }
 0x2c3   : > { %v875_v50 = vmul.f32 %v2638_v49, %v867_v45 }
 0x2c5   : > { %v877_v52 = vsel %vm876_vm2, %v867_v45, %v875_v50  ;;  %v1386_v45 = vmul.f32 %v3201_v41, %v3201_v41 }
 0x2c6   : > { %v880_v53 = vsel %vm878_vm3, %v879_v51, %v877_v52 }
 0x2c7   : > { %v2640_v54 = vpop.eup %2639  ;;  %v895_v55 = vmax.f32 %v880_v53, 1e-12 }
 0x2c8   : > { %v882_v56 = vmul.f32 %v2640_v54, %v870_v46 }
 0x2c9   : > { %2645 = vrcp.f32 %v895_v55  ;;  %v1884_v55 = vld [vmem:[%s3522_s6 + $0x80] sm:$0xff] }
 0x2ca   : > { %v884_v58 = vsel %vm883_vm4, %v870_v46, %v882_v56  ;;  %v1885_v56 = vld [vmem:[%s3522_s6 + $0x88] sm:$0xff] }
 0x2cb   : > { %v2642_v59 = vpop.eup %2641  ;;  %v887_v60 = vsel %vm885_vm5, %v886_v57, %v884_v58 }
 0x2cc   : > { %v2644_v61 = vpop.eup %2643  ;;  %v896_v62 = vmax.f32 %v887_v60, 1e-12  ;;  %v846_v63 = vmul.f32 %v2642_v59, %v844_v47 }
 0x2cd   : > { %v889_v2 = vmul.f32 %v2644_v61, %v873_v48  ;;  %v2486_v61 = vpack.c.bf16 %v1885_v56, %v1884_v55  ;;  %v1920_v55 = vld [vmem:[%s3524_s8 + $0xa0] sm:$0xff]  ;;  %v1921_v56 = vld [vmem:[%s3524_s8 + $0xa8] sm:$0xff] }
 0x2ce   : > { %2647 = vrcp.f32 %v896_v62  ;;  %v848_v3 = vsel %vm847_vm6, %v844_v47, %v846_v63  ;;  %v1391_v47 = vsel %vm841_vm1, %v1386_v45, 0.0  ;;  %v1886_v63 = vld [vmem:[%s3522_s6 + $0x90] sm:$0xff] }
 0x2cf   : > { %v891_v5 = vsel %vm890_vm7, %v873_v48, %v889_v2  ;;  %v851_v7 = vsel %vm849_vm8, %v850_v1, %v848_v3  ;;  %v1887_v1 = vld [vmem:[%s3522_s6 + $0x98] sm:$0xff] }
 0x2d0   : > { %v894_v8 = vsel %vm892_vm9, %v893_v4, %v891_v5  ;;  %v852_v10 = vmax.f32 %v851_v7, 1e-12  ;;  %v2489_v5 = vpack.c.bf16 %v1887_v1, %v1886_v63  ;;  %v1926_v63 = vld [vmem:[%s3524_s8 + $0xd0] sm:$0xff]  ;;  %v1927_v1 = vld [vmem:[%s3524_s8 + $0xd8] sm:$0xff] }
 0x2d1   : > { %v897_v9 = vmax.f32 %v894_v8, 1e-12  ;;  %v1888_v8 = vld [vmem:[%s3522_s6 + $0xa0] sm:$0xff] }
 0x2d3   : > { %v2646_v11 = vpop.eup %2645  ;;  %2649 = vrcp.f32 %v897_v9  ;;  %v1889_v9 = vld [vmem:[%s3522_s6 + $0xa8] sm:$0xff] }
 0x2d4   : > { %2651 = vrcp.f32 %v852_v10  ;;  %v899_v12 = vmul.f32 %v2646_v11, %v3171_v13 }
 0x2d6   : > { %v910_v19 = vmul.f32 %v3209_v15, %v899_v12 }
 0x2d8   : > { %v2648_v14 = vpop.eup %2647 }
 0x2d9   : > { %v901_v16 = vmul.f32 %v2648_v14, %v3178_v18 }
 0x2db   : > { %v911_v21 = vmul.f32 %v3209_v15, %v901_v16 }
 0x2dd   : > { %v2479_v23 = vpack.c.bf16 %v911_v21, %v910_v19  ;;  %v2650_v13 = vpop.eup %2649  ;;  %v2492_v19 = vpack.c.bf16 %v1889_v9, %v1888_v8  ;;  %v1931_v8 = vld [vmem:[%s3524_s8 + $0xf8] sm:$0xff] }
 0x2de   : > { %v2652_v25 = vpop.eup %2651  ;;  %v903_v18 = vmul.f32 %v2650_v13, %v3185_v26  ;;  %v1891_v13 = vld [vmem:[%s3522_s6 + $0xb8] sm:$0xff] }
 0x2df   : > { %2481 = vmatpush3.bf16.xpose.msk.msra.mxu1 %vm3216_vm10, %v2479_v23  ;;  %v854_v24 = vmul.f32 %v2652_v25, %v3176_v17  ;;  %v1890_v23 = vld [vmem:[%s3522_s6 + $0xb0] sm:$0xff] }
 0x2e0   : > { %2219 = vmatprep.subr.mxu1 %v2745_v0  ;;  %v912_v27 = vmul.f32 %v3209_v15, %v903_v18  ;;  %v2495_v18 = vpack.c.bf16 %v1891_v13, %v1890_v23 }
 0x2e1   : > { %v861_v31 = vmul.f32 %v3229_v30, %v854_v24 }
 0x2e7   : > { %2220 = vmatpush3.xpose.msk.msra.mxu1 %vm841_vm1, %v912_v27  ;;  %v1892_v27 = vld [vmem:[%s3522_s6 + $0xc0] sm:$0xff] }
 0x2e8   : > { %2482 = vmatprep.subr.bf16.mxu1 %v2743_v6 }
 0x2ea   : > { %2222 = vmatmul.mubr.msk.f32.vlgmr.msra.gmra.mrb[6].mxu1 %vm841_vm1, %v861_v31  ;;  %v1893_v31 = vld [vmem:[%s3522_s6 + $0xc8] sm:$0xff] }
 0x2eb   : > { %2484 = vmatpush3.bf16.msra.mxu1 %v2483_v35  ;;  %2230 = vmatprep.mubr.msk.f32.mxu1 %vm2744_vm0, %v2745_v0  ;;  %v1394_v35 = vsel %vm841_vm1, %v1387_v28, 0.0 }
 0x2ec   : > { %2228 = vmatprep.subr.mxu1 %v2745_v0 }
 0x2ef   : > { %2229 = vmatpush3.msra.mxu1 %v3197_v37 }
 0x2f0   : > { %2485 = vmatprep.subr.bf16.mxu1 %v2743_v6 }
 0x3bd   : > { %v991_v17 = vpop.f32.mrb[6].mxu1 }
 0x3be   : > { %v995_v26 = vmul.f32 8.0, %v991_v17  ;;  %v2223_v33 = vpop.f32.mrb[7].mxu1  ;;  %v2498_v17 = vpack.c.bf16 %v1893_v31, %v1892_v27 }
 0x3bf   : > { %v1894_v33 = vld [vmem:[%s3522_s6 + $0xd0] sm:$0xff] }
 0x3c0   : > { %v997_v38 = vsel %vm996_vm11, %v995_v26, -inf }
 0x3c1   : > { %998 = vmax.xlane.f32.xlu0 %v997_v38  ;;  %v2501_v38 = vpack.c.bf16 %v1895_v36, %v1894_v33 }
 0x3c5   : > { %1389 = vadd.xlane.f32.xlu0 %v1388_v34 }
 0x3c9   : > { %1395 = vadd.xlane.f32.xlu0 %v1394_v35  ;;  %v1896_v35 = vld [vmem:[%s3522_s6 + $0xe0] sm:$0xff] }
 0x44e   : > { %v999_v37 = vpop.xlane.xlu0 %998 }
 0x44f   : > { %v1000_v40 = vsub.f32 %v995_v26, %v999_v37  ;;  %v1897_v37 = vld [vmem:[%s3522_s6 + $0xe8] sm:$0xff] }
 0x451   : > { %v1001_v42 = vmul.f32 1.442695, %v1000_v40 }
 0x452   : > { %v1390_v48 = vpop.xlane.xlu0 %1389 }
 0x453   : > { %2653 = vpow2.f32 %v1001_v42  ;;  %vm1399_vm12 = vcmp.eq.f32.partialorder %v1390_v48, inf  ;;  %v1402_v57 = vand.u32 2147483648, %v1390_v48  ;;  %vm1401_vm13 = vcmp.eq.f32.partialorder %v1390_v48, 0.0 }
 0x454   : > { %2655 = vrsqrt.f32 %v1390_v48  ;;  %v2504_v42 = vpack.c.bf16 %v1897_v37, %v1896_v35 }
 0x456   : > { %v1396_v49 = vpop.xlane.xlu0 %1395 }
 0x457   : > { %2657 = vrsqrt.f32 %v1396_v49  ;;  %vm1413_vm14 = vcmp.eq.f32.partialorder %v1396_v49, inf  ;;  %v1416_v14 = vand.u32 2147483648, %v1396_v49  ;;  %vm1415_vm3 = vcmp.eq.f32.partialorder %v1396_v49, 0.0 }
 0x45d   : > { %v2654_v44 = vpop.eup %2653 }
 0x45e   : > { %v1003_v46 = vsel %vm996_vm11, %v2654_v44, 0.0  ;;  %v2656_v51 = vpop.eup %2655 }
 0x45f   : > { %1004 = vadd.xlane.f32.xlu1 %v1003_v46  ;;  %v1398_v52 = vmul.f32 %v2656_v51, %v1390_v48  ;;  %v1899_v46 = vld [vmem:[%s3522_s6 + $0xf8] sm:$0xff] }
 0x461   : > { %v1400_v54 = vsel %vm1399_vm12, %v1390_v48, %v1398_v52  ;;  %v2658_v58 = vpop.eup %2657 }
 0x462   : > { %v1403_v60 = vsel %vm1401_vm13, %v1402_v57, %v1400_v54  ;;  %v1412_v3 = vmul.f32 %v2658_v58, %v1396_v49  ;;  %v1922_v57 = vld [vmem:[%s3524_s8 + $0xb0] sm:$0xff]  ;;  %v1923_v58 = vld [vmem:[%s3524_s8 + $0xb8] sm:$0xff] }
 0x463   : > { %1392 = vadd.xlane.f32.xlu1 %v1391_v47  ;;  %v1418_v2 = vmax.f32 %v1403_v60, 1e-12  ;;  %v1924_v60 = vld [vmem:[%s3524_s8 + $0xc0] sm:$0xff] }
 0x464   : > { %v1414_v11 = vsel %vm1413_vm14, %v1396_v49, %v1412_v3  ;;  %v1916_v49 = vld [vmem:[%s3524_s8 + $0x80] sm:$0xff] }
 0x465   : > { %v1417_v25 = vsel %vm1415_vm3, %v1416_v14, %v1414_v11  ;;  %v1928_v3 = vld [vmem:[%s3524_s8 + $0xe0] sm:$0xff] }
 0x466   : > { %v1420_v24 = vmax.f32 %v1417_v25, 1e-12 }
 0x4ec   : > { %v1005_v50 = vpop.xlane.xlu1 %1004 }
 0x4ed   : > { %2659 = vrcp.f32 %v1005_v50  ;;  %v1917_v50 = vld [vmem:[%s3524_s8 + $0x88] sm:$0xff] }
 0x4ee   : > { %v2534_v52 = vpack.c.bf16 %v1917_v50, %v1916_v49  ;;  %v1940_v49 = vld [vmem:[%s3525_s9 + $0x58] sm:$0xff] }
 0x4f0   : > { %v1393_v53 = vpop.xlane.xlu1 %1392 }
 0x4f1   : > { %2661 = vrsqrt.f32 %v1393_v53  ;;  %vm1406_vm15 = vcmp.eq.f32.partialorder %v1393_v53, inf  ;;  %v1409_v10 = vand.u32 2147483648, %v1393_v53  ;;  %vm1408_vm2 = vcmp.eq.f32.partialorder %v1393_v53, 0.0 }
 0x4f2   : > { %2663 = vrcp.f32 %v1418_v2  ;;  %v2549_v2 = vpack.c.bf16 %v1927_v1, %v1926_v63  ;;  %v1085_v63 = vld [vmem:[%s3525_s9 + $0x20] sm:$0xff]  ;;  %v1086_v1 = vld [vmem:[%s3525_s9 + $0x28] sm:$0xff] }
 0x4f7   : > { %v2660_v59 = vpop.eup %2659 }
 0x4f8   : > { %v1007_v62 = vmul.f32 %v2660_v59, %v2654_v44  ;;  %v2543_v59 = vpack.c.bf16 %v1923_v58, %v1922_v57 }
 0x4fa   : > { %2231 = vmatmul.mubr.msk.f32.vlgmr.msra.gmra.mrb[8].mxu1 %vm996_vm11, %v1007_v62 }
 0x4fb   : > { %v2662_v4 = vpop.eup %2661  ;;  %2487 = vmatpush3.bf16.msra.mxu1 %v2486_v61  ;;  %2265 = vmatprep.mubr.msk.f32.mxu1 %vm2744_vm0, %v2745_v0  ;;  %v1925_v61 = vld [vmem:[%s3524_s8 + $0xc8] sm:$0xff] }
 0x4fc   : > { %v1405_v7 = vmul.f32 %v2662_v4, %v1393_v53  ;;  %2488 = vmatprep.subr.bf16.mxu1 %v2743_v6  ;;  %v2664_v26 = vpop.eup %2663  ;;  %v2546_v62 = vpack.c.bf16 %v1925_v61, %v1924_v60  ;;  %v1929_v4 = vld [vmem:[%s3524_s8 + $0xe8] sm:$0xff]  ;;  %v1083_v60 = vld [vmem:[%s3525_s9 + $0x10] sm:$0xff]  ;;  %v1084_v61 = vld [vmem:[%s3525_s9 + $0x18] sm:$0xff] }
 0x4fd   : > { %v1422_v28 = vmul.f32 %v2664_v26, %v3199_v39  ;;  %v1898_v39 = vld [vmem:[%s3522_s6 + $0xf0] sm:$0xff] }
 0x4fe   : > { %v1407_v12 = vsel %vm1406_vm15, %v1393_v53, %v1405_v7  ;;  %v1919_v53 = vld [vmem:[%s3524_s8 + $0x98] sm:$0xff]  ;;  %v1930_v7 = vld [vmem:[%s3524_s8 + $0xf0] sm:$0xff] }
 0x4ff   : > { %v1410_v16 = vsel %vm1408_vm2, %v1409_v10, %v1407_v12  ;;  %2490 = vmatpush3.bf16.msra.mxu1 %v2489_v5  ;;  %v1427_v44 = vmul.f32 %v3209_v15, %v1422_v28  ;;  %v2552_v5 = vpack.c.bf16 %v1929_v4, %v1928_v3  ;;  %v2555_v9 = vpack.c.bf16 %v1931_v8, %v1930_v7  ;;  %v1087_v3 = vld [vmem:[%s3525_s9 + $0x30] sm:$0xff] }
 0x500   : > { %v1419_v21 = vmax.f32 %v1410_v16, 1e-12  ;;  %2491 = vmatprep.subr.bf16.mxu1 %v2743_v6 }
 0x502   : > { %2665 = vrcp.f32 %v1419_v21 }
 0x503   : > { %2493 = vmatpush3.bf16.msra.mxu1 %v2492_v19  ;;  %2667 = vrcp.f32 %v1420_v24 }
 0x504   : > { %2494 = vmatprep.subr.bf16.mxu1 %v2743_v6 }
 0x507   : > { %2496 = vmatpush3.bf16.msra.mxu1 %v2495_v18 }
 0x508   : > { %2497 = vmatprep.subr.bf16.mxu1 %v2743_v6 }
 0x50b   : > { %2499 = vmatpush3.bf16.msra.mxu1 %v2498_v17 }
 0x50c   : > { %v2666_v34 = vpop.eup %2665  ;;  %2500 = vmatprep.subr.bf16.mxu1 %v2743_v6 }
 0x50d   : > { %v1424_v40 = vmul.f32 %v2666_v34, %v3201_v41  ;;  %v2668_v48 = vpop.eup %2667  ;;  %v2507_v41 = vpack.c.bf16 %v1899_v46, %v1898_v39  ;;  %v1937_v46 = vld [vmem:[%s3525_s9 + $0x40] sm:$0xff] }
 0x50e   : > { %v1426_v51 = vmul.f32 %v2668_v48, %v3203_v43  ;;  %v2537_v43 = vpack.c.bf16 %v1919_v53, %v1918_v22  ;;  %v1939_v48 = vld [vmem:[%s3525_s9 + $0x50] sm:$0xff] }
 0x50f   : > { %2502 = vmatpush3.bf16.msra.mxu1 %v2501_v38  ;;  %v1428_v45 = vmul.f32 %v3209_v15, %v1424_v40  ;;  %v2568_v50 = vpack.c.bf16 %v1940_v49, %v1939_v48  ;;  %v1943_v53 = vld [vmem:[%s3525_s9 + $0x70] sm:$0xff] }
 0x510   : > { %2503 = vmatprep.subr.bf16.mxu1 %v2743_v6  ;;  %v1429_v54 = vmul.f32 %v3209_v15, %v1426_v51  ;;  %v2540_v15 = vpack.c.bf16 %v1921_v56, %v1920_v55  ;;  %v1941_v51 = vld [vmem:[%s3525_s9 + $0x60] sm:$0xff] }
 0x511   : > { %v2558_v47 = vpack.c.bf16 %v1428_v45, %v1427_v44  ;;  %v1081_v56 = vld [vmem:[%s3525_s9] sm:$0xff] }
 0x513   : > { %2505 = vmatpush3.bf16.msra.mxu1 %v2504_v42  ;;  %2560 = vmatpush3.bf16.xpose.msk.msra.mxu0 %vm3216_vm10, %v2558_v47  ;;  %v1938_v47 = vld [vmem:[%s3525_s9 + $0x48] sm:$0xff] }
 0x514   : > { %2506 = vmatprep.subr.bf16.mxu1 %v2743_v6  ;;  %2354 = vmatprep.subr.mxu0 %v2745_v0 }
 0x517   : > { %2508 = vmatpush3.bf16.msra.mxu1 %v2507_v41  ;;  %v2565_v41 = vpack.c.bf16 %v1938_v47, %v1937_v46 }
 0x518   : > { %2533 = vmatprep.subr.bf16.mxu1 %v2743_v6 }
 0x51a   : > { %2266 = vmatmul.mubr.f32.vlgmr.msra.gmra.mrb[10].mxu1 %v3034_v29 }
 0x51b   : > { %2535 = vmatpush3.bf16.msra.mxu1 %v2534_v52  ;;  %2355 = vmatpush3.xpose.msk.msra.mxu0 %vm841_vm1, %v1429_v54  ;;  %v1942_v52 = vld [vmem:[%s3525_s9 + $0x68] sm:$0xff]  ;;  %v1944_v54 = vld [vmem:[%s3525_s9 + $0x78] sm:$0xff] }
 0x51c   : > { %2536 = vmatprep.subr.bf16.mxu1 %v2743_v6  ;;  %2341 = vmatprep.mubr.msk.f32.mxu1 %vm2744_vm0, %v2745_v0  ;;  %v2571_v22 = vpack.c.bf16 %v1942_v52, %v1941_v51 }
 0x51d   : > { %2561 = vmatprep.subr.bf16.mxu0 %v2743_v6 }
 0x51f   : > { %2538 = vmatpush3.bf16.msra.mxu1 %v2537_v43  ;;  %v2574_v43 = vpack.c.bf16 %v1944_v54, %v1943_v53 }
 0x520   : > { %2539 = vmatprep.subr.bf16.mxu1 %v2743_v6 }
 0x523   : > { %2541 = vmatpush3.bf16.msra.mxu1 %v2540_v15  ;;  %v1082_v15 = vld [vmem:[%s3525_s9 + $0x8] sm:$0xff] }
 0x524   : > { %2542 = vmatprep.subr.bf16.mxu1 %v2743_v6  ;;  %v2577_v58 = vpack.c.bf16 %v1082_v15, %v1081_v56 }
 0x527   : > { %2544 = vmatpush3.bf16.msra.mxu1 %v2543_v59 }
 0x528   : > { %2545 = vmatprep.subr.bf16.mxu1 %v2743_v6 }
 0x52b   : > { %2547 = vmatpush3.bf16.msra.mxu1 %v2546_v62  ;;  %v2580_v62 = vpack.c.bf16 %v1084_v61, %v1083_v60 }
 0x52c   : > { %2548 = vmatprep.subr.bf16.mxu1 %v2743_v6 }
 0x52f   : > { %2550 = vmatpush3.bf16.msra.mxu1 %v2549_v2  ;;  %v2583_v2 = vpack.c.bf16 %v1086_v1, %v1085_v63 }
 0x530   : > { %2551 = vmatprep.subr.bf16.mxu1 %v2743_v6 }
 0x533   : > { %2553 = vmatpush3.bf16.msra.mxu1 %v2552_v5 }
 0x534   : > { %2554 = vmatprep.subr.bf16.mxu1 %v2743_v6 }
 0x537   : > { %2556 = vmatpush3.bf16.msra.mxu1 %v2555_v9 }
 0x538   : > { %2564 = vmatprep.subr.bf16.mxu1 %v2743_v6 }
 0x53a   : > { %2342 = vmatmul.mubr.f32.vlgmr.msra.gmra.mrb[12].mxu1 %v3019_v20 }
 0x53b   : > { %2344 = vmatprep.mubr.msk.f32.mxu1 %vm2744_vm0, %v2745_v0  ;;  %2566 = vmatpush3.bf16.msra.mxu1 %v2565_v41 }
 0x53c   : > { %2567 = vmatprep.subr.bf16.mxu1 %v2743_v6 }
 0x53e   : > { %2345 = vmatmul.mubr.f32.gmra.mrb[14].mxu1 %v3042_v32 }
 0x53f   : > { %2347 = vmatprep.mubr.msk.f32.mxu1 %vm2744_vm0, %v2745_v0  ;;  %2569 = vmatpush3.bf16.msra.mxu1 %v2568_v50 }
 0x540   : > { %2570 = vmatprep.subr.bf16.mxu1 %v2743_v6 }
 0x542   : > { %2348 = vmatmul.mubr.f32.gmra.mrb[16].mxu1 %v3034_v29 }
 0x543   : > { %2384 = vmatprep.mubr.msk.f32.mxu1 %vm2744_vm0, %v2745_v0  ;;  %2572 = vmatpush3.bf16.msra.mxu1 %v2571_v22 }
 0x544   : > { %2573 = vmatprep.subr.bf16.mxu1 %v2743_v6 }
 0x547   : > { %2575 = vmatpush3.bf16.msra.mxu1 %v2574_v43 }
 0x5cd   : > { %v3392_v10 = vpop.f32.mrb[8].mxu1 }
 0x5ce   : > { %v2232_v11 = vpop.f32.mrb[9].mxu1 }
 0x5ed   : > { %v1172_v12 = vpop.f32.mrb[10].mxu1 }
 0x5ee   : > { %v1370_v14 = vmul.f32 %v1172_v12, %v1172_v12  ;;  %v2267_v16 = vpop.f32.mrb[11].mxu1 }
 0x5f0   : > { %v1371_v20 = vsel %vm841_vm1, %v1370_v14, 0.0 }
 0x5f1   : > { %1372 = vadd.xlane.f32.xlu1 %v1371_v20 }
 0x60d   : > { %v1356_v19 = vpop.f32.mrb[12].mxu1 }
 0x60e   : > { %v2343_v21 = vpop.f32.mrb[13].mxu1 }
 0x611   : > { %v1361_v32 = vpop.f32.mrb[14].mxu1 }
 0x612   : > { %v2562_v23 = vpack.c.bf16 %v1361_v32, %v1356_v19  ;;  %v2346_v13 = vpop.f32.mrb[15].mxu1 }
 0x613   : > { %v1947_v13 = vld [vmem:[%s3528_s12] ss:$0 sm:$0xff] }
 0x615   : > { %v1366_v25 = vpop.f32.mrb[16].mxu1 }
 0x616   : > { %v2349_v18 = vpop.f32.mrb[17].mxu1 }
 0x617   : > { %v1948_v18 = vld [vmem:[%s3529_s13] ss:$0 sm:$0xff] }
 0x67e   : > { %v1373_v29 = vpop.xlane.xlu1 %1372 }
 0x67f   : > { %2669 = vrsqrt.f32 %v1373_v29  ;;  %vm1376_vm4 = vcmp.eq.f32.partialorder %v1373_v29, inf  ;;  %v1379_v31 = vand.u32 2147483648, %v1373_v29  ;;  %vm1378_vm5 = vcmp.eq.f32.partialorder %v1373_v29, 0.0 }
 0x689   : > { %v2670_v24 = vpop.eup %2669 }
 0x68a   : > { %v1375_v27 = vmul.f32 %v2670_v24, %v1373_v29 }
 0x68c   : > { %v1377_v17 = vsel %vm1376_vm4, %v1373_v29, %v1375_v27 }
 0x68d   : > { %v1380_v26 = vsel %vm1378_vm5, %v1379_v31, %v1377_v17 }
 0x68e   : > { %v1381_v33 = vmax.f32 %v1380_v26, 1e-12 }
 0x690   : > { %2671 = vrcp.f32 %v1381_v33 }
 0x69a   : > { %v2672_v36 = vpop.eup %2671 }
 0x69b   : > { %v1383_v38 = vmul.f32 %v2672_v36, %v1172_v12 }
 0x69d   : > { %v1384_v28 = vmul.f32 %v3229_v30, %v1383_v38 }
 0x69f   : > { %2357 = vmatmul.mubr.msk.f32.vlgmr.msra.gmra.mrb[14].mxu0 %vm841_vm1, %v1384_v28 }
 0x6a0   : > { %2563 = vmatpush3.bf16.msra.mxu0 %v2562_v23  ;;  %2365 = vmatprep.mubr.msk.f32.mxu0 %vm2744_vm0, %v2745_v0 }
 0x6a1   : > { %2363 = vmatprep.subr.mxu0 %v2745_v0 }
 0x6a4   : > { %2364 = vmatpush3.msra.mxu0 %v1366_v25 }
 0x6a5   : > { %2576 = vmatprep.subr.bf16.mxu0 %v2743_v6 }
 0x772   : > { %v1508_v34 = vpop.f32.mrb[14].mxu0 }
 0x773   : > { %v1512_v35 = vmul.f32 8.0, %v1508_v34  ;;  %v2358_v37 = vpop.f32.mrb[15].mxu0 }
 0x775   : > { %v1513_v40 = vsel %vm996_vm11, %v1512_v35, -inf }
 0x776   : > { %1514 = vmax.xlane.f32.xlu0 %v1513_v40 }
 0x803   : > { %v1515_v42 = vpop.xlane.xlu0 %1514 }
 0x804   : > { %v1516_v44 = vsub.f32 %v1512_v35, %v1515_v42 }
 0x806   : > { %v1517_v30 = vmul.f32 1.442695, %v1516_v44 }
 0x808   : > { %2673 = vpow2.f32 %v1517_v30 }
 0x812   : > { %v2674_v45 = vpop.eup %2673 }
 0x813   : > { %v1519_v39 = vsel %vm996_vm11, %v2674_v45, 0.0 }
 0x814   : > { %1520 = vadd.xlane.f32.xlu1 %v1519_v39 }
 0x8a1   : > { %v1521_v55 = vpop.xlane.xlu1 %1520 }
 0x8a2   : > { %2675 = vrcp.f32 %v1521_v55 }
 0x8ac   : > { %v2676_v57 = vpop.eup %2675 }
 0x8ad   : > { %v1523_v59 = vmul.f32 %v2676_v57, %v2674_v45 }
 0x8af   : > { %2366 = vmatmul.mubr.msk.f32.vlgmr.msra.gmra.mrb[16].mxu0 %vm996_vm11, %v1523_v59 }
 0x8b0   : > { %2578 = vmatpush3.bf16.msra.mxu0 %v2577_v58  ;;  %2403 = vmatprep.mubr.msk.f32.mxu0 %vm2744_vm0, %v2745_v0  ;;  %v1088_v0 = vld [vmem:[%s3525_s9 + $0x38] sm:$0xff] }
 0x8b1   : > { %2579 = vmatprep.subr.bf16.mxu0 %v2743_v6  ;;  %v2586_v4 = vpack.c.bf16 %v1088_v0, %v1087_v3 }
 0x8b4   : > { %2581 = vmatpush3.bf16.msra.mxu0 %v2580_v62 }
 0x8b5   : > { %2582 = vmatprep.subr.bf16.mxu0 %v2743_v6 }
 0x8b8   : > { %2584 = vmatpush3.bf16.msra.mxu0 %v2583_v2 }
 0x8b9   : > { %2585 = vmatprep.subr.bf16.mxu0 %v2743_v6 }
 0x8bc   : > { %2587 = vmatpush3.bf16.msra.mxu0 %v2586_v4 }
 0x8bf   : > { %2404 = vmatmul.mubr.msk.f32.vlgmr.msra.gmra.mrb[18].mxu0 %vm841_vm1, %v3392_v10 }
 0x982   : > { %v1593_v5 = vpop.f32.mrb[16].mxu0 }
 0x983   : > { %v2367_v7 = vpop.f32.mrb[17].mxu0  ;;  %2385 = vmatmul.mubr.msk.f32.vlgmr.msra.gmra.mrb[18].mxu1 %vm841_vm1, %v1593_v5 }
 0x992   : > { %v1748_v8 = vpop.f32.mrb[18].mxu0 }
 0x993   : > { %v2405_v9 = vpop.f32.mrb[19].mxu0 }
 0xa56   : > { %v1675_v11 = vpop.f32.mrb[18].mxu1 }
 0xa57   : > { %v1749_v12 = vadd.f32 %v1748_v8, %v1675_v11  ;;  %v2386_v14 = vpop.f32.mrb[19].mxu1 }
 0xa59   : > { %1754 = vadd.xlane.f32.xlu0 %v1749_v12 }
 0xae6   : > { %v1755_v16 = vpop.xlane.xlu0 %1754 }
 0xae7   : > { %v1756_v20 = vmul.f32 0.0078125, %v1755_v16 }
 0xae9   : > { %v1757_v19 = vsub.f32 %v1749_v12, %v1756_v20 }
 0xaeb   : > { %v1758_v6 = vmul.f32 %v1757_v19, %v1757_v19 }
 0xaed   : > { %1759 = vadd.xlane.f32.xlu1 %v1758_v6 }
 0xb7a   : > { %v1760_v21 = vpop.xlane.xlu1 %1759 }
 0xb7b   : > { %v1761_v32 = vmul.f32 0.0078125, %v1760_v21 }
 0xb7d   : > { %v1762_v10 = vadd.f32 1e-05, %v1761_v32 }
 0xb7f   : > { %2677 = vrsqrt.f32 %v1762_v10 }
 0xb89   : > { %v2678_v23 = vpop.eup %2677 }
 0xb8a   : > { %v1764_v25 = vmul.f32 %v2678_v23, %v1757_v19 }
 0xb8c   : > { %v1771_v29 = vmul.f32 %v1947_v13, %v1764_v25 }
 0xb8e   : > { %v1778_v24 = vadd.f32 %v1948_v18, %v1771_v29 }
 0xb90   : > { %1779 = vst [vmem:[%s473_s25] sm:$0xff] %v1778_v24 }
 0xb91   : > { %2692 = shalt.err (!%p2689_p3)
}
 0xb92   : > { %s2693_s19 = scalar_lea.hbm %s3474_s22, 128  ;;  %s2697_s25 = scalar_lea.hbm %s3530_s14, 256 }
 0xb93   : > { %p2694_p4 = scmp.ne.s32.totalorder %s3474_s22, %s2693_s19  ;;  %p2698_p9 = scmp.lt.u32.totalorder %s3474_s22, %s3530_s14 }
 0xb94   : > { %p2699_p10 = scmp.lt.u32.totalorder %s2697_s25, %s2693_s19  ;;  %p2701_p12 = scmp.lt.u32.totalorder %s2693_s19, %s3474_s22 }
 0xb95   : > { %p2695_p7 = pnand %p2694_p4, %p2860_p5 }
 0xb96   : > { %p2700_p11 = por %p2699_p10, %p2698_p9 }
 0xb97   : > { %p2696_p8 = pneg %p2695_p7 }
 0xb98   : > { %p2702_p13 = por %p2701_p12, %p2700_p11 }
 0xb9a   : > { %p2703_p0 = pnand %p2702_p13, %p2696_p8 }
 0xb9c   : > { %2706 = shalt.err (!%p2703_p0)
}
 0xb9d   : > { %2589 = dma.vmem_to_hbm [thread:$0]  (%p2860_p5), %s3476_s28, 128, %s3474_s22, %s1781_s29  }
 0xb9e PF: > { %s3545_s27 = sld [smem:[#allocation6_spill]]  ;;  %p2595_p1 = scmp.ge.s32.totalorder %s2741_s16, 2 }
 0xba0   : > { %p2592_p2 = pnand %p2595_p1, %p2864_p6 }
 0xba4   : > { %s1806_s24 = sand.u32 1, %s3545_s27  }
 0xba5   : > { %s1807_s18 = scalar_lea.sflag [#allocation4], %s1806_s24 }
 0xba6   : > { %2724 = dma.done.wait (!%p2592_p2), %s1807_s18, 128  }
 0xba7   : > { %2726 = vsyncadd (!%p2592_p2), %s1807_s18, 4294967168  ;;  %s3547_s16 = sld [smem:[#allocation8_spill]]  ;;  %s3548_s19 = sld [smem:[#allocation7_spill]] }
 0xba8   : > { %s3549_s15 = sld [smem:[#allocation9_spill]]  ;;  %s3550_s29 = smov %s2733_s30 }
 0xbad   : > { %p24_p3 = scmp.ge.s32.totalorder %s3547_s16, 4   ;;  %s3551_s30 = smov %s3548_s19 }
 0xbaf   :  { %26 = sbr.rel (!%p24_p3) target bundleno = 3 (0x3), region = 118 }
 0xbb6   :  { %1812 = vsyncpa [#allocation4], 1 }
 0xbb7   :  { %1814 = vsyncpa [#allocation4 + $0x1], 1 }

</bundles_post_ra>
